<compile_context>
chip_gen: v7x
topology: tpu7x:2x2x1
jax: 0.10.0
libtpu: 0.0.40
codegen_flags: <defaults>
</compile_context>

<pallas_src>
import functools

import jax
import jax.numpy as jnp
from jax.experimental import pallas as pl
from jax.experimental.pallas import tpu as pltpu


def _focal_loss_kernel(logits_ref, targets_ref, alpha_ref, out_ref, *,
                       n_rows, gamma, inv_scale):
    """One grid step over tile_n rows of the batch.

    logits_ref : (tile_n, C) native dtype  logits tile
    targets_ref: (tile_n, 1) int32         target class id per row
    alpha_ref  : (1, C)      float32       per-class alpha, VMEM-resident
    out_ref    : (1, 1)      float32       resident scalar accumulator
    """
    i = pl.program_id(0)
    tile_n = logits_ref.shape[0]

    @pl.when(i == 0)
    def _init():
        out_ref[...] = jnp.zeros_like(out_ref)

    x = logits_ref[...].astype(jnp.float32)          # cast after DMA (VPU has slack)
    t = targets_ref[...]                             # (tile_n, 1) int32

    # Numerically stable log-softmax pieces over the class (lane) axis.
    m = jnp.max(x, axis=-1, keepdims=True)
    denom = jnp.sum(jnp.exp(x - m), axis=-1, keepdims=True)

    # Select the target lane via a lane-iota compare (replaces torch scatter_);
    # where-select + sum instead of materializing an f32 one-hot and multiplying.
    lane = jax.lax.broadcasted_iota(jnp.int32, x.shape, 1)
    sel = lane == t
    x_t = jnp.sum(jnp.where(sel, x, 0.0), axis=-1, keepdims=True)       # logits[target]
    a = jnp.sum(jnp.where(sel, alpha_ref[...], 0.0),
                axis=-1, keepdims=True)                                 # alpha[target]

    log_p = (x_t - m) - jnp.log(denom)               # log softmax(x)[target]
    p = jnp.exp(log_p)

    one_m_p = 1.0 - p
    if gamma == 2:                                   # gamma is static: avoid lax.pow
        focal = one_m_p * one_m_p
    elif gamma == 1:
        focal = one_m_p
    elif gamma == 0:
        focal = jnp.ones_like(one_m_p)
    else:
        focal = one_m_p ** gamma

    loss = -a * focal * log_p                        # (tile_n, 1)

    # Mask tail-tile rows beyond the real batch: partial-block rows are garbage,
    # and jnp.where keeps their NaN/Inf out of the accumulator (0 * NaN trap).
    row = jax.lax.broadcasted_iota(jnp.int32, (tile_n, 1), 0) + i * tile_n
    loss = jnp.where(row < n_rows, loss, 0.0)

    out_ref[...] += jnp.sum(loss, axis=0, keepdims=True)

    @pl.when(i == pl.num_programs(0) - 1)
    def _finalize():
        out_ref[...] = out_ref[...] * inv_scale


def focal_loss(logits, targets, alpha=None, gamma=2, size_average=True,
               tile_n=4096):
    """logits: (N, C) float (any dtype), targets: (N,) int -> scalar focal loss."""
    n, c = logits.shape
    if alpha is None:
        alpha = jnp.ones((c,), jnp.float32)
    alpha = jnp.asarray(alpha, jnp.float32).reshape(1, c)
    t = jnp.asarray(targets, jnp.int32).reshape(n, 1)

    # Tile sizing: lane-padded f32 intermediates dominate VMEM.  Keep
    # (2x double-buffered input + ~4 tile-sized f32 temps) well under the
    # 32 MiB scoped limit so the same tile also fits v7x (64 MiB physical).
    c_lanes = ((c + 127) // 128) * 128               # physical lane footprint
    max_rows_by_vmem = max(8, (20 * 1024 * 1024) // (6 * c_lanes * 4))
    tile_n = max(8, min(int(tile_n), max_rows_by_vmem, ((n + 7) // 8) * 8))
    tile_n = ((tile_n + 7) // 8) * 8
    num_tiles = pl.cdiv(n, tile_n)

    inv_scale = (1.0 / n) if size_average else 1.0
    kernel = functools.partial(_focal_loss_kernel, n_rows=n, gamma=gamma,
                               inv_scale=inv_scale)

    cost = pl.CostEstimate(
        flops=8 * n * c + 8 * n,
        transcendentals=n * c + 2 * n,               # exp per element; log+exp per row
        bytes_accessed=n * c * logits.dtype.itemsize + n * 4 + c * 4 + 4,
    )

    out = pl.pallas_call(
        kernel,
        out_shape=jax.ShapeDtypeStruct((1, 1), jnp.float32),
        grid_spec=pltpu.PrefetchScalarGridSpec(
            num_scalar_prefetch=0,
            grid=(num_tiles,),
            in_specs=[
                pl.BlockSpec((tile_n, c), lambda i: (i, 0)),   # logits, native dtype
                pl.BlockSpec((tile_n, 1), lambda i: (i, 0)),   # targets
                pl.BlockSpec((1, c), lambda i: (0, 0)),        # alpha, resident
            ],
            out_specs=pl.BlockSpec((1, 1), lambda i: (0, 0)),  # resident accumulator
        ),
        compiler_params=pltpu.CompilerParams(
            dimension_semantics=("arbitrary",),      # scalar reduction across row tiles
            vmem_limit_bytes=32 * 1024 * 1024,       # explicit for v5e's 16 MiB default
        ),
        cost_estimate=cost,
    )(logits, t, alpha)
    return out[0, 0]


def _ref_focal(logits, targets, alpha, gamma, size_average):
    """Pure-JAX mirror of the PyTorch FocalLoss.forward."""
    P = jax.nn.softmax(logits.astype(jnp.float32), axis=1)
    p = P[jnp.arange(logits.shape[0]), targets]
    a = alpha[targets]
    batch_loss = -a * (1.0 - p) ** gamma * jnp.log(p)
    return batch_loss.mean() if size_average else batch_loss.sum()


if __name__ == "__main__":
    key = jax.random.PRNGKey(0)
    k1, k2, k3, k4 = jax.random.split(key, 4)

    # Case 1: single tile covers the whole batch, default alpha, mean reduction.
    n1, c1 = 256, 10
    logits1 = jax.random.normal(k1, (n1, c1), jnp.float32)
    targets1 = jax.random.randint(k2, (n1,), 0, c1, jnp.int32)
    loss1 = jax.jit(functools.partial(focal_loss, gamma=2, size_average=True))(
        logits1, targets1)
    jax.block_until_ready(loss1)

    # Case 2: multi-tile grid with a partial tail tile, odd class count,
    # per-class alpha, sum reduction.
    n2, c2 = 300, 7
    logits2 = jax.random.normal(k3, (n2, c2), jnp.float32) * 3.0
    targets2 = jax.random.randint(k4, (n2,), 0, c2, jnp.int32)
    alpha2 = jnp.linspace(0.25, 1.0, c2, dtype=jnp.float32)
    loss2 = jax.jit(functools.partial(focal_loss, alpha=alpha2, gamma=2,
                                      size_average=False, tile_n=64))(
        logits2, targets2)
    jax.block_until_ready(loss2)

    ref1 = _ref_focal(logits1, targets1, jnp.ones((c1,), jnp.float32), 2, True)
    ref2 = _ref_focal(logits2, targets2, alpha2, 2, False)

    assert loss1.shape == () and loss2.shape == ()
    assert bool(jnp.isfinite(loss1)) and bool(jnp.isfinite(loss2))
    assert bool(jnp.allclose(loss1, ref1, rtol=1e-4, atol=1e-5)), (float(loss1), float(ref1))
    assert bool(jnp.allclose(loss2, ref2, rtol=1e-4, atol=1e-4)), (float(loss2), float(ref2))
    print("KERNEL_OK")
</pallas_src>

<mosaic_0001>
module attributes {stable_mosaic.version = 11 : i64} {
  func.func @_focal_loss_kernel(%arg0: i32, %arg1: memref<256x10xf32, #tpu.memory_space<vmem>>, %arg2: memref<256x1xi32, #tpu.memory_space<vmem>>, %arg3: memref<1x10xf32, #tpu.memory_space<vmem>>, %arg4: memref<1x1xf32, #tpu.memory_space<vmem>>) attributes {dimension_semantics = [#tpu.dimension_semantics<arbitrary>], iteration_bounds = array<i64: 1>, scalar_prefetch = 0 : i64, scratch_operands = 0 : i64, tpu.core_type = #tpu.core_type<tc>, window_params = [{transform_indices = @transform_0, window_bounds = array<i64: 256, 10>}, {transform_indices = @transform_1, window_bounds = array<i64: 256, 1>}, {pipeline_mode = #tpu.pipeline_mode<synchronous>, transform_indices = @transform_2, window_bounds = array<i64: 1, 10>}, {pipeline_mode = #tpu.pipeline_mode<synchronous>, transform_indices = @transform_3, window_bounds = array<i64: 1, 1>}]} {
    %c0_i32 = arith.constant 0 : i32
    %0 = arith.cmpi eq, %arg0, %c0_i32 : i32
    %1 = arith.extui %0 : i1 to i32
    %c0_i32_0 = arith.constant 0 : i32
    %2 = arith.cmpi ne, %1, %c0_i32_0 : i32
    scf.if %2 {
      %cst_22 = arith.constant 0.000000e+00 : f32
      %53 = vector.broadcast %cst_22 : f32 to vector<1x1xf32>
      %c0_23 = arith.constant 0 : index
      %c0_24 = arith.constant 0 : index
      %54 = vector.load %arg4[%c0_23, %c0_24] : memref<1x1xf32, #tpu.memory_space<vmem>>, vector<1x1xf32>
      tpu.vector_store %arg4[%c0_23, %c0_24], %53 {strides = array<i32>} : memref<1x1xf32, #tpu.memory_space<vmem>>, vector<1x1xf32>,
    } else {
    }
    %c0 = arith.constant 0 : index
    %c0_1 = arith.constant 0 : index
    %3 = vector.load %arg1[%c0, %c0_1] : memref<256x10xf32, #tpu.memory_space<vmem>>, vector<256x10xf32>
    %c0_2 = arith.constant 0 : index
    %c0_3 = arith.constant 0 : index
    %4 = vector.load %arg2[%c0_2, %c0_3] : memref<256x1xi32, #tpu.memory_space<vmem>>, vector<256x1xi32>
    %cst = arith.constant dense<0xFF800000> : vector<256xf32>
    %5 = vector.multi_reduction <maximumf>, %3, %cst [1] : vector<256x10xf32> to vector<256xf32>
    %6 = vector.shape_cast %5 : vector<256xf32> to vector<256x1xf32>
    %7 = vector.broadcast %6 : vector<256x1xf32> to vector<256x10xf32>
    %8 = arith.subf %3, %7 : vector<256x10xf32>
    %9 = math.exp %8 : vector<256x10xf32>
    %cst_4 = arith.constant dense<0.000000e+00> : vector<256xf32>
    %10 = vector.multi_reduction <add>, %9, %cst_4 [1] : vector<256x10xf32> to vector<256xf32>
    %11 = vector.shape_cast %10 : vector<256xf32> to vector<256x1xf32>
    %12 = tpu.iota {dimensions = array<i32: 1>} : vector<256x10xi32>
    %13 = vector.broadcast %4 : vector<256x1xi32> to vector<256x10xi32>
    %14 = arith.cmpi eq, %12, %13 : vector<256x10xi32>
    %cst_5 = arith.constant 0.000000e+00 : f32
    %15 = vector.broadcast %cst_5 : f32 to vector<256x10xf32>
    %16 = arith.select %14, %3, %15 : vector<256x10xi1>, vector<256x10xf32>
    %cst_6 = arith.constant dense<0.000000e+00> : vector<256xf32>
    %17 = vector.multi_reduction <add>, %16, %cst_6 [1] : vector<256x10xf32> to vector<256xf32>
    %18 = vector.shape_cast %17 : vector<256xf32> to vector<256x1xf32>
    %c0_7 = arith.constant 0 : index
    %c0_8 = arith.constant 0 : index
    %19 = vector.load %arg3[%c0_7, %c0_8] : memref<1x10xf32, #tpu.memory_space<vmem>>, vector<1x10xf32>
    %cst_9 = arith.constant 0.000000e+00 : f32
    %20 = vector.shape_cast %19 : vector<1x10xf32> to vector<1x10xf32>
    %21 = vector.broadcast %20 : vector<1x10xf32> to vector<256x10xf32>
    %22 = vector.broadcast %cst_9 : f32 to vector<256x10xf32>
    %23 = arith.select %14, %21, %22 : vector<256x10xi1>, vector<256x10xf32>
    %cst_10 = arith.constant dense<0.000000e+00> : vector<256xf32>
    %24 = vector.multi_reduction <add>, %23, %cst_10 [1] : vector<256x10xf32> to vector<256xf32>
    %25 = vector.shape_cast %24 : vector<256xf32> to vector<256x1xf32>
    %26 = arith.subf %18, %6 : vector<256x1xf32>
    %27 = math.log %11 : vector<256x1xf32>
    %28 = arith.subf %26, %27 : vector<256x1xf32>
    %29 = math.exp %28 : vector<256x1xf32>
    %cst_11 = arith.constant 1.000000e+00 : f32
    %30 = vector.broadcast %cst_11 : f32 to vector<256x1xf32>
    %31 = arith.subf %30, %29 : vector<256x1xf32>
    %32 = arith.mulf %31, %31 : vector<256x1xf32>
    %cst_12 = arith.constant 0.000000e+00 : f32
    %33 = vector.broadcast %cst_12 : f32 to vector<256x1xf32>
    %34 = arith.subf %33, %25 : vector<256x1xf32>
    %35 = arith.mulf %34, %32 : vector<256x1xf32>
    %36 = arith.mulf %35, %28 : vector<256x1xf32>
    %37 = tpu.iota {dimensions = array<i32: 0>} : vector<256x1xi32>
    %c256_i32 = arith.constant 256 : i32
    %38 = arith.muli %arg0, %c256_i32 : i32
    %39 = vector.broadcast %38 : i32 to vector<256x1xi32>
    %40 = arith.addi %37, %39 : vector<256x1xi32>
    %c256_i32_13 = arith.constant 256 : i32
    %41 = vector.broadcast %c256_i32_13 : i32 to vector<256x1xi32>
    %42 = arith.cmpi slt, %40, %41 : vector<256x1xi32>
    %cst_14 = arith.constant 0.000000e+00 : f32
    %43 = vector.broadcast %cst_14 : f32 to vector<256x1xf32>
    %44 = arith.select %42, %36, %43 : vector<256x1xi1>, vector<256x1xf32>
    %c0_15 = arith.constant 0 : index
    %c0_16 = arith.constant 0 : index
    %45 = vector.load %arg4[%c0_15, %c0_16] : memref<1x1xf32, #tpu.memory_space<vmem>>, vector<1x1xf32>
    %cst_17 = arith.constant dense<0.000000e+00> : vector<1xf32>
    %46 = vector.multi_reduction <add>, %44, %cst_17 [0] : vector<256x1xf32> to vector<1xf32>
    %47 = vector.shape_cast %46 : vector<1xf32> to vector<1x1xf32>
    %48 = arith.addf %45, %47 : vector<1x1xf32>
    %c0_18 = arith.constant 0 : index
    %c0_19 = arith.constant 0 : index
    %49 = vector.load %arg4[%c0_18, %c0_19] : memref<1x1xf32, #tpu.memory_space<vmem>>, vector<1x1xf32>
    tpu.vector_store %arg4[%c0_18, %c0_19], %48 {strides = array<i32>} : memref<1x1xf32, #tpu.memory_space<vmem>>, vector<1x1xf32>,
    %c0_i32_20 = arith.constant 0 : i32
    %50 = arith.cmpi eq, %arg0, %c0_i32_20 : i32
    %51 = arith.extui %50 : i1 to i32
    %c0_i32_21 = arith.constant 0 : i32
    %52 = arith.cmpi ne, %51, %c0_i32_21 : i32
    scf.if %52 {
      %c0_22 = arith.constant 0 : index
      %c0_23 = arith.constant 0 : index
      %53 = vector.load %arg4[%c0_22, %c0_23] : memref<1x1xf32, #tpu.memory_space<vmem>>, vector<1x1xf32>
      %cst_24 = arith.constant 3.906250e-03 : f32
      %54 = vector.broadcast %cst_24 : f32 to vector<1x1xf32>
      %55 = arith.mulf %53, %54 : vector<1x1xf32>
      %c0_25 = arith.constant 0 : index
      %c0_26 = arith.constant 0 : index
      %56 = vector.load %arg4[%c0_25, %c0_26] : memref<1x1xf32, #tpu.memory_space<vmem>>, vector<1x1xf32>
      tpu.vector_store %arg4[%c0_25, %c0_26], %55 {strides = array<i32>} : memref<1x1xf32, #tpu.memory_space<vmem>>, vector<1x1xf32>,
    } else {
    }
    return
  }
  func.func @transform_0(%arg0: i32) -> (i32, i32) {
    %c0_i32 = arith.constant 0 : i32
    %c0_i32_0 = arith.constant 0 : i32
    return %arg0, %c0_i32 : i32, i32
  }
  func.func @transform_1(%arg0: i32) -> (i32, i32) {
    %c0_i32 = arith.constant 0 : i32
    %c0_i32_0 = arith.constant 0 : i32
    return %arg0, %c0_i32 : i32, i32
  }
  func.func @transform_2(%arg0: i32) -> (i32, i32) {
    %c0_i32 = arith.constant 0 : i32
    %c0_i32_0 = arith.constant 0 : i32
    %c0_i32_1 = arith.constant 0 : i32
    return %c0_i32, %c0_i32_0 : i32, i32
  }
  func.func @transform_3(%arg0: i32) -> (i32, i32) {
    %c0_i32 = arith.constant 0 : i32
    %c0_i32_0 = arith.constant 0 : i32
    %c0_i32_1 = arith.constant 0 : i32
    return %c0_i32, %c0_i32_0 : i32, i32
  }
}

</mosaic_0001>

<bundles_post_ra>
// kernel: focal_loss.1
= control target key start
LH: loop header
LB: loop body
LE: loop exit
PB: predicated region body
PF: predicated region fallthrough
CT: control target
= control target key end

     0   :  { %vm85_vm0 = vcmask 80896   ;;  %s2940_s0 = inlined_call_operand.vmem [shape: f32[256,10], index: 0, kind: input, shape index: {}]   ;;  %s2941_s1 = inlined_call_operand.vmem [shape: s32[256,1], index: 1, kind: input, shape index: {}]   ;;  %s2942_s2 = inlined_call_operand.vmem [shape: f32[1,10], index: 2, kind: input, shape index: {}]   ;;  %s2943_s3 = inlined_call_operand.hbm [shape: f32[1,1], index: 3, kind: output, shape index: {}]  }
   0x1   :  { %v1568_v0 = vld [vmem:[%s2940_s0] sm:$0xff]  ;;  %v1573_v1 = vld [vmem:[%s2940_s0 + $0x10] sm:$0xff]  ;;  %v1578_v2 = vld [vmem:[%s2940_s0 + $0x8] sm:$0xff] }
   0x2   :  { %v86_v3 = vsel %vm85_vm0, %v1568_v0, -inf  ;;  %v92_v4 = vsel %vm85_vm0, %v1573_v1, -inf  ;;  %v1587_v5 = vld [vmem:[%s2940_s0 + $0x18] sm:$0xff]  ;;  %v89_v6 = vsel %vm85_vm0, %v1578_v2, -inf  ;;  %v1596_v8 = vld [vmem:[%s2940_s0 + $0x28] sm:$0xff]  ;;  %v1601_v9 = vld [vmem:[%s2940_s0 + $0x20] sm:$0xff] }
   0x3   :  { %87 = vmax.xlane.f32.xlu0 %v86_v3  ;;  %93 = vmax.xlane.f32.xlu1 %v92_v4  ;;  %v95_v7 = vsel %vm85_vm0, %v1587_v5, -inf  ;;  %v101_v10 = vsel %vm85_vm0, %v1596_v8, -inf  ;;  %v98_v11 = vsel %vm85_vm0, %v1601_v9, -inf  ;;  %v1610_v12 = vld [vmem:[%s2940_s0 + $0x38] sm:$0xff]  ;;  %v1615_v13 = vld [vmem:[%s2940_s0 + $0x30] sm:$0xff] }
   0x4   :  { %v107_v14 = vsel %vm85_vm0, %v1610_v12, -inf  ;;  %v104_v15 = vsel %vm85_vm0, %v1615_v13, -inf }
   0x7   :  { %90 = vmax.xlane.f32.xlu0 %v89_v6  ;;  %96 = vmax.xlane.f32.xlu1 %v95_v7 }
   0xb   :  { %102 = vmax.xlane.f32.xlu1 %v101_v10  ;;  %99 = vmax.xlane.f32.xlu0 %v98_v11 }
   0xc   :  { %8 = vsyncpa [#allocation3], 0  ;;  %v1624_v16 = vld [vmem:[%s2940_s0 + $0x48] sm:$0xff]  ;;  %v1629_v17 = vld [vmem:[%s2940_s0 + $0x40] sm:$0xff]  ;;  %v1542_v3 = vmov 0  }
   0xd   :  { %v113_v18 = vsel %vm85_vm0, %v1624_v16, -inf  ;;  %v110_v19 = vsel %vm85_vm0, %v1629_v17, -inf  ;;  %v1638_v20 = vld [vmem:[%s2940_s0 + $0x58] sm:$0xff]  ;;  %v1643_v21 = vld [vmem:[%s2940_s0 + $0x50] sm:$0xff]  ;;  %v1652_v24 = vld [vmem:[%s2940_s0 + $0x68] sm:$0xff]  ;;  %1316 = vset.pattern.permute.xlu1 %v1542_v3  ;;  %1315 = vset.pattern.permute.xlu0 %v1542_v3 }
   0xe   :  { %v119_v22 = vsel %vm85_vm0, %v1638_v20, -inf  ;;  %v116_v23 = vsel %vm85_vm0, %v1643_v21, -inf  ;;  %v1657_v25 = vld [vmem:[%s2940_s0 + $0x60] sm:$0xff]  ;;  %v125_v26 = vsel %vm85_vm0, %v1652_v24, -inf  ;;  %v1666_v28 = vld [vmem:[%s2940_s0 + $0x78] sm:$0xff]  ;;  %v1671_v29 = vld [vmem:[%s2940_s0 + $0x70] sm:$0xff] }
   0xf   :  { %108 = vmax.xlane.f32.xlu1 %v107_v14  ;;  %105 = vmax.xlane.f32.xlu0 %v104_v15  ;;  %v122_v27 = vsel %vm85_vm0, %v1657_v25, -inf  ;;  %v131_v30 = vsel %vm85_vm0, %v1666_v28, -inf  ;;  %v128_v31 = vsel %vm85_vm0, %v1671_v29, -inf  ;;  %v1680_v32 = vld [vmem:[%s2940_s0 + $0x88] sm:$0xff]  ;;  %v1685_v33 = vld [vmem:[%s2940_s0 + $0x80] sm:$0xff]  ;;  %v1694_v36 = vld [vmem:[%s2940_s0 + $0x98] sm:$0xff] }
  0x10   :  { %v137_v34 = vsel %vm85_vm0, %v1680_v32, -inf  ;;  %v134_v35 = vsel %vm85_vm0, %v1685_v33, -inf  ;;  %v1699_v37 = vld [vmem:[%s2940_s0 + $0x90] sm:$0xff]  ;;  %v143_v38 = vsel %vm85_vm0, %v1694_v36, -inf  ;;  %v1708_v40 = vld [vmem:[%s2940_s0 + $0xa8] sm:$0xff]  ;;  %v1713_v41 = vld [vmem:[%s2940_s0 + $0xa0] sm:$0xff] }
  0x11   :  { %v140_v39 = vsel %vm85_vm0, %v1699_v37, -inf  ;;  %v149_v42 = vsel %vm85_vm0, %v1708_v40, -inf  ;;  %v146_v43 = vsel %vm85_vm0, %v1713_v41, -inf  ;;  %v1722_v44 = vld [vmem:[%s2940_s0 + $0xb8] sm:$0xff]  ;;  %v1727_v45 = vld [vmem:[%s2940_s0 + $0xb0] sm:$0xff]  ;;  %v1736_v48 = vld [vmem:[%s2940_s0 + $0xc8] sm:$0xff] }
  0x12   :  { %v155_v46 = vsel %vm85_vm0, %v1722_v44, -inf  ;;  %v152_v47 = vsel %vm85_vm0, %v1727_v45, -inf  ;;  %v1741_v49 = vld [vmem:[%s2940_s0 + $0xc0] sm:$0xff]  ;;  %v161_v50 = vsel %vm85_vm0, %v1736_v48, -inf  ;;  %v1750_v52 = vld [vmem:[%s2940_s0 + $0xd8] sm:$0xff]  ;;  %v1755_v53 = vld [vmem:[%s2940_s0 + $0xd0] sm:$0xff] }
  0x13   :  { %114 = vmax.xlane.f32.xlu1 %v113_v18  ;;  %111 = vmax.xlane.f32.xlu0 %v110_v19  ;;  %v158_v51 = vsel %vm85_vm0, %v1741_v49, -inf  ;;  %v167_v54 = vsel %vm85_vm0, %v1750_v52, -inf  ;;  %v164_v55 = vsel %vm85_vm0, %v1755_v53, -inf  ;;  %v1764_v56 = vld [vmem:[%s2940_s0 + $0xe8] sm:$0xff]  ;;  %v1769_v57 = vld [vmem:[%s2940_s0 + $0xe0] sm:$0xff]  ;;  %v1778_v60 = vld [vmem:[%s2940_s0 + $0xf0] sm:$0xff] }
  0x14   :  { %v173_v58 = vsel %vm85_vm0, %v1764_v56, -inf  ;;  %v170_v59 = vsel %vm85_vm0, %v1769_v57, -inf  ;;  %v1783_v61 = vld [vmem:[%s2940_s0 + $0xf8] sm:$0xff]  ;;  %v176_v62 = vsel %vm85_vm0, %v1778_v60, -inf }
  0x15   :  { %v179_v63 = vsel %vm85_vm0, %v1783_v61, -inf }
  0x17   :  { %120 = vmax.xlane.f32.xlu1 %v119_v22  ;;  %117 = vmax.xlane.f32.xlu0 %v116_v23 }
  0x1b   :  { %126 = vmax.xlane.f32.xlu1 %v125_v26  ;;  %123 = vmax.xlane.f32.xlu0 %v122_v27 }
  0x1f   :  { %132 = vmax.xlane.f32.xlu1 %v131_v30  ;;  %129 = vmax.xlane.f32.xlu0 %v128_v31 }
  0x23   :  { %138 = vmax.xlane.f32.xlu1 %v137_v34  ;;  %135 = vmax.xlane.f32.xlu0 %v134_v35 }
  0x27   :  { %144 = vmax.xlane.f32.xlu1 %v143_v38  ;;  %141 = vmax.xlane.f32.xlu0 %v140_v39 }
  0x2b   :  { %150 = vmax.xlane.f32.xlu1 %v149_v42  ;;  %147 = vmax.xlane.f32.xlu0 %v146_v43 }
  0x2f   :  { %156 = vmax.xlane.f32.xlu1 %v155_v46  ;;  %153 = vmax.xlane.f32.xlu0 %v152_v47 }
  0x33   :  { %162 = vmax.xlane.f32.xlu1 %v161_v50  ;;  %159 = vmax.xlane.f32.xlu0 %v158_v51 }
  0x37   :  { %168 = vmax.xlane.f32.xlu1 %v167_v54  ;;  %165 = vmax.xlane.f32.xlu0 %v164_v55 }
  0x3b   :  { %174 = vmax.xlane.f32.xlu1 %v173_v58  ;;  %171 = vmax.xlane.f32.xlu0 %v170_v59 }
  0x3f   :  { %177 = vmax.xlane.f32.xlu0 %v176_v62  ;;  %180 = vmax.xlane.f32.xlu1 %v179_v63 }
  0x90   :  { %v1789_v4 = vpop.xlane.xlu0 %87  ;;  %v1791_v6 = vpop.xlane.xlu1 %93 }
  0x91   :  { %v182_v7 = vsub.f32 %v1568_v0, %v1789_v4  ;;  %v184_v10 = vsub.f32 %v1573_v1, %v1791_v6 }
  0x93   :  { %v214_v11 = vmul.f32 1.442695, %v182_v7  ;;  %v218_v14 = vmul.f32 1.442695, %v184_v10 }
  0x94   :  { %v1797_v15 = vpop.xlane.xlu0 %90  ;;  %v1799_v18 = vpop.xlane.xlu1 %96 }
  0x95   :  { %1317 = vpow2.f32 %v214_v11  ;;  %v183_v19 = vsub.f32 %v1578_v2, %v1797_v15  ;;  %v185_v22 = vsub.f32 %v1587_v5, %v1799_v18 }
  0x96   :  { %1319 = vpow2.f32 %v218_v14 }
  0x97   :  { %v216_v23 = vmul.f32 1.442695, %v183_v19  ;;  %v220_v26 = vmul.f32 1.442695, %v185_v22 }
  0x98   :  { %v1805_v27 = vpop.xlane.xlu1 %102  ;;  %v1807_v30 = vpop.xlane.xlu0 %99 }
  0x99   :  { %1321 = vpow2.f32 %v216_v23  ;;  %v187_v31 = vsub.f32 %v1596_v8, %v1805_v27  ;;  %v186_v34 = vsub.f32 %v1601_v9, %v1807_v30 }
  0x9a   :  { %1323 = vpow2.f32 %v220_v26 }
  0x9b   :  { %v224_v35 = vmul.f32 1.442695, %v187_v31  ;;  %v222_v38 = vmul.f32 1.442695, %v186_v34 }
  0x9c   :  { %v1813_v39 = vpop.xlane.xlu1 %108  ;;  %v1815_v42 = vpop.xlane.xlu0 %105 }
  0x9d   :  { %2970 = vst [vmem:[#allocation5_spill] sm:$0xff] %v1813_v39  ;;  %2971 = vst [vmem:[#allocation6_spill] sm:$0xff] %v1815_v42  ;;  %1325 = vpow2.f32 %v224_v35  ;;  %v189_v43 = vsub.f32 %v1610_v12, %v1813_v39  ;;  %v188_v46 = vsub.f32 %v1615_v13, %v1815_v42 }
  0x9e   :  { %1327 = vpow2.f32 %v222_v38 }
  0x9f   :  { %v1318_v47 = vpop.eup %1317  ;;  %v228_v50 = vmul.f32 1.442695, %v189_v43  ;;  %v226_v51 = vmul.f32 1.442695, %v188_v46 }
  0xa0   :  { %v1320_v54 = vpop.eup %1319  ;;  %v278_v55 = vsel %vm85_vm0, %v1318_v47, 0.0  ;;  %v1822_v58 = vpop.xlane.xlu1 %114 }
  0xa1   :  { %2972 = vst [vmem:[#allocation7_spill] sm:$0xff] %v1822_v58  ;;  %v1824_v59 = vpop.xlane.xlu0 %111  ;;  %1329 = vpow2.f32 %v228_v50  ;;  %279 = vadd.xlane.f32.xlu0 %v278_v55  ;;  %v191_v62 = vsub.f32 %v1624_v16, %v1822_v58  ;;  %v284_v3 = vsel %vm85_vm0, %v1320_v54, 0.0 }
  0xa2   :  { %2973 = vst [vmem:[#allocation8_spill] sm:$0xff] %v1824_v59  ;;  %v190_v63 = vsub.f32 %v1629_v17, %v1824_v59  ;;  %1331 = vpow2.f32 %v226_v51 }
  0xa3   :  { %v1322_v7 = vpop.eup %1321  ;;  %v232_v10 = vmul.f32 1.442695, %v191_v62 }
  0xa4   :  { %v230_v11 = vmul.f32 1.442695, %v190_v63  ;;  %v1324_v14 = vpop.eup %1323  ;;  %v281_v19 = vsel %vm85_vm0, %v1322_v7, 0.0  ;;  %v1832_v22 = vpop.xlane.xlu1 %120 }
  0xa5   :  { %2974 = vst [vmem:[#allocation9_spill] sm:$0xff] %v1832_v22  ;;  %v1834_v23 = vpop.xlane.xlu0 %117  ;;  %1333 = vpow2.f32 %v232_v10  ;;  %285 = vadd.xlane.f32.xlu0 %v284_v3  ;;  %282 = vadd.xlane.f32.xlu1 %v281_v19  ;;  %v193_v26 = vsub.f32 %v1638_v20, %v1832_v22  ;;  %v287_v34 = vsel %vm85_vm0, %v1324_v14, 0.0  ;;  %v374_v22 = vlaneseq }
  0xa6   :  { %2975 = vst [vmem:[#allocation10_spill] sm:$0xff] %v1834_v23  ;;  %v192_v31 = vsub.f32 %v1643_v21, %v1834_v23  ;;  %1335 = vpow2.f32 %v230_v11 }
  0xa7   :  { %v1326_v35 = vpop.eup %1325  ;;  %v236_v38 = vmul.f32 1.442695, %v193_v26  ;;  %v2101_v58 = vand.u32 127, %v374_v22 }
  0xa8   :  { %v234_v43 = vmul.f32 1.442695, %v192_v31  ;;  %v1328_v46 = vpop.eup %1327  ;;  %v1841_v47 = vpop.xlane.xlu1 %126  ;;  %v293_v62 = vsel %vm85_vm0, %v1326_v35, 0.0 }
  0xa9   :  { %2976 = vst [vmem:[#allocation11_spill] sm:$0xff] %v1841_v47  ;;  %v1843_v50 = vpop.xlane.xlu0 %123  ;;  %1337 = vpow2.f32 %v236_v38  ;;  %288 = vadd.xlane.f32.xlu1 %v287_v34  ;;  %v195_v51 = vsub.f32 %v1652_v24, %v1841_v47  ;;  %v290_v55 = vsel %vm85_vm0, %v1328_v46, 0.0 }
  0xaa   :  { %2977 = vst [vmem:[#allocation12_spill] sm:$0xff] %v1843_v50  ;;  %v194_v54 = vsub.f32 %v1657_v25, %v1843_v50  ;;  %1339 = vpow2.f32 %v234_v43  ;;  %291 = vadd.xlane.f32.xlu0 %v290_v55 }
  0xab   :  { %v1330_v63 = vpop.eup %1329  ;;  %v240_v3 = vmul.f32 1.442695, %v195_v51 }
  0xac   :  { %v238_v7 = vmul.f32 1.442695, %v194_v54  ;;  %v1332_v10 = vpop.eup %1331  ;;  %v1851_v11 = vpop.xlane.xlu1 %132  ;;  %v299_v34 = vsel %vm85_vm0, %v1330_v63, 0.0 }
  0xad   :  { %2978 = vst [vmem:[#allocation13_spill] sm:$0xff] %v1851_v11  ;;  %v1853_v14 = vpop.xlane.xlu0 %129  ;;  %1341 = vpow2.f32 %v240_v3  ;;  %294 = vadd.xlane.f32.xlu1 %v293_v62  ;;  %v197_v19 = vsub.f32 %v1666_v28, %v1851_v11  ;;  %v296_v31 = vsel %vm85_vm0, %v1332_v10, 0.0 }
  0xae   :  { %2979 = vst [vmem:[#allocation14_spill] sm:$0xff] %v1853_v14  ;;  %v196_v26 = vsub.f32 %v1671_v29, %v1853_v14  ;;  %1343 = vpow2.f32 %v238_v7  ;;  %297 = vadd.xlane.f32.xlu0 %v296_v31 }
  0xaf   :  { %v1334_v35 = vpop.eup %1333  ;;  %v244_v38 = vmul.f32 1.442695, %v197_v19 }
  0xb0   :  { %v242_v43 = vmul.f32 1.442695, %v196_v26  ;;  %v1336_v46 = vpop.eup %1335  ;;  %v1861_v51 = vpop.xlane.xlu1 %138  ;;  %v305_v3 = vsel %vm85_vm0, %v1334_v35, 0.0 }
  0xb1   :  { %2980 = vst [vmem:[#allocation15_spill] sm:$0xff] %v1861_v51  ;;  %v1863_v54 = vpop.xlane.xlu0 %135  ;;  %1345 = vpow2.f32 %v244_v38  ;;  %300 = vadd.xlane.f32.xlu1 %v299_v34  ;;  %v199_v55 = vsub.f32 %v1680_v32, %v1861_v51  ;;  %v302_v63 = vsel %vm85_vm0, %v1336_v46, 0.0 }
  0xb2   :  { %2981 = vst [vmem:[#allocation16_spill] sm:$0xff] %v1863_v54  ;;  %v198_v62 = vsub.f32 %v1685_v33, %v1863_v54  ;;  %1347 = vpow2.f32 %v242_v43  ;;  %303 = vadd.xlane.f32.xlu0 %v302_v63 }
  0xb3   :  { %v1338_v7 = vpop.eup %1337  ;;  %v248_v10 = vmul.f32 1.442695, %v199_v55 }
  0xb4   :  { %v246_v19 = vmul.f32 1.442695, %v198_v62  ;;  %v1340_v26 = vpop.eup %1339  ;;  %v1871_v31 = vpop.xlane.xlu1 %144  ;;  %v311_v43 = vsel %vm85_vm0, %v1338_v7, 0.0 }
  0xb5   :  { %2982 = vst [vmem:[#allocation17_spill] sm:$0xff] %v1871_v31  ;;  %v1873_v38 = vpop.xlane.xlu0 %141  ;;  %1349 = vpow2.f32 %v248_v10  ;;  %306 = vadd.xlane.f32.xlu1 %v305_v3  ;;  %v201_v34 = vsub.f32 %v1694_v36, %v1871_v31  ;;  %v308_v35 = vsel %vm85_vm0, %v1340_v26, 0.0 }
  0xb6   :  { %2983 = vst [vmem:[#allocation18_spill] sm:$0xff] %v1873_v38  ;;  %v200_v46 = vsub.f32 %v1699_v37, %v1873_v38  ;;  %1351 = vpow2.f32 %v246_v19  ;;  %309 = vadd.xlane.f32.xlu0 %v308_v35 }
  0xb7   :  { %v1342_v55 = vpop.eup %1341  ;;  %v252_v62 = vmul.f32 1.442695, %v201_v34 }
  0xb8   :  { %v250_v63 = vmul.f32 1.442695, %v200_v46  ;;  %v1344_v51 = vpop.eup %1343  ;;  %v1881_v54 = vpop.xlane.xlu1 %150  ;;  %v317_v19 = vsel %vm85_vm0, %v1342_v55, 0.0 }
  0xb9   :  { %2984 = vst [vmem:[#allocation19_spill] sm:$0xff] %v1881_v54  ;;  %v1883_v10 = vpop.xlane.xlu0 %147  ;;  %1353 = vpow2.f32 %v252_v62  ;;  %312 = vadd.xlane.f32.xlu1 %v311_v43  ;;  %v203_v3 = vsub.f32 %v1708_v40, %v1881_v54  ;;  %v314_v7 = vsel %vm85_vm0, %v1344_v51, 0.0 }
  0xba   :  { %2985 = vst [vmem:[#allocation20_spill] sm:$0xff] %v1883_v10  ;;  %v202_v26 = vsub.f32 %v1713_v41, %v1883_v10  ;;  %1355 = vpow2.f32 %v250_v63  ;;  %315 = vadd.xlane.f32.xlu0 %v314_v7 }
  0xbb   :  { %v1346_v34 = vpop.eup %1345  ;;  %v256_v46 = vmul.f32 1.442695, %v203_v3 }
  0xbc   :  { %v254_v35 = vmul.f32 1.442695, %v202_v26  ;;  %v1348_v31 = vpop.eup %1347  ;;  %v1891_v38 = vpop.xlane.xlu1 %156  ;;  %v323_v63 = vsel %vm85_vm0, %v1346_v34, 0.0 }
  0xbd   :  { %2986 = vst [vmem:[#allocation21_spill] sm:$0xff] %v1891_v38  ;;  %v1893_v62 = vpop.xlane.xlu0 %153  ;;  %1357 = vpow2.f32 %v256_v46  ;;  %318 = vadd.xlane.f32.xlu1 %v317_v19  ;;  %v205_v43 = vsub.f32 %v1722_v44, %v1891_v38  ;;  %v320_v55 = vsel %vm85_vm0, %v1348_v31, 0.0 }
  0xbe   :  { %2987 = vst [vmem:[#allocation22_spill] sm:$0xff] %v1893_v62  ;;  %v204_v51 = vsub.f32 %v1727_v45, %v1893_v62  ;;  %1359 = vpow2.f32 %v254_v35  ;;  %321 = vadd.xlane.f32.xlu0 %v320_v55 }
  0xbf   :  { %v1350_v3 = vpop.eup %1349  ;;  %v260_v26 = vmul.f32 1.442695, %v205_v43 }
  0xc0   :  { %v258_v7 = vmul.f32 1.442695, %v204_v51  ;;  %v1352_v54 = vpop.eup %1351  ;;  %v1901_v10 = vpop.xlane.xlu1 %162  ;;  %v329_v34 = vsel %vm85_vm0, %v1350_v3, 0.0 }
  0xc1   :  { %2988 = vst [vmem:[#allocation23_spill] sm:$0xff] %v1901_v10  ;;  %v1903_v46 = vpop.xlane.xlu0 %159  ;;  %1361 = vpow2.f32 %v260_v26  ;;  %324 = vadd.xlane.f32.xlu1 %v323_v63  ;;  %v207_v44 = vsub.f32 %v1736_v48, %v1901_v10  ;;  %v326_v19 = vsel %vm85_vm0, %v1352_v54, 0.0 }
  0xc2   :  { %2989 = vst [vmem:[#allocation24_spill] sm:$0xff] %v1903_v46  ;;  %v206_v31 = vsub.f32 %v1741_v49, %v1903_v46  ;;  %1363 = vpow2.f32 %v258_v7  ;;  %327 = vadd.xlane.f32.xlu0 %v326_v19 }
  0xc3   :  { %v1354_v35 = vpop.eup %1353  ;;  %v264_v43 = vmul.f32 1.442695, %v207_v44 }
  0xc4   :  { %v262_v51 = vmul.f32 1.442695, %v206_v31  ;;  %v1356_v55 = vpop.eup %1355  ;;  %v1911_v38 = vpop.xlane.xlu1 %168  ;;  %v335_v63 = vsel %vm85_vm0, %v1354_v35, 0.0 }
  0xc5   :  { %2990 = vst [vmem:[#allocation25_spill] sm:$0xff] %v1911_v38  ;;  %v1913_v26 = vpop.xlane.xlu0 %165  ;;  %1365 = vpow2.f32 %v264_v43  ;;  %330 = vadd.xlane.f32.xlu1 %v329_v34  ;;  %v209_v48 = vsub.f32 %v1750_v52, %v1911_v38  ;;  %v332_v54 = vsel %vm85_vm0, %v1356_v55, 0.0 }
  0xc6   :  { %2991 = vst [vmem:[#allocation26_spill] sm:$0xff] %v1913_v26  ;;  %v208_v49 = vsub.f32 %v1755_v53, %v1913_v26  ;;  %1367 = vpow2.f32 %v262_v51  ;;  %333 = vadd.xlane.f32.xlu0 %v332_v54 }
  0xc7   :  { %v1358_v3 = vpop.eup %1357  ;;  %v268_v7 = vmul.f32 1.442695, %v209_v48 }
  0xc8   :  { %v266_v44 = vmul.f32 1.442695, %v208_v49  ;;  %v1360_v31 = vpop.eup %1359  ;;  %v1921_v19 = vpop.xlane.xlu1 %174  ;;  %v341_v35 = vsel %vm85_vm0, %v1358_v3, 0.0 }
  0xc9   :  { %2992 = vst [vmem:[#allocation27_spill] sm:$0xff] %v1921_v19  ;;  %v1923_v43 = vpop.xlane.xlu0 %171  ;;  %1369 = vpow2.f32 %v268_v7  ;;  %336 = vadd.xlane.f32.xlu1 %v335_v63  ;;  %v211_v52 = vsub.f32 %v1764_v56, %v1921_v19  ;;  %v338_v34 = vsel %vm85_vm0, %v1360_v31, 0.0 }
  0xca   :  { %2993 = vst [vmem:[#allocation28_spill] sm:$0xff] %v1923_v43  ;;  %v210_v53 = vsub.f32 %v1769_v57, %v1923_v43  ;;  %1371 = vpow2.f32 %v266_v44  ;;  %339 = vadd.xlane.f32.xlu0 %v338_v34 }
  0xcb   :  { %v1362_v51 = vpop.eup %1361  ;;  %v272_v55 = vmul.f32 1.442695, %v211_v52 }
  0xcc   :  { %v270_v48 = vmul.f32 1.442695, %v210_v53  ;;  %v1364_v49 = vpop.eup %1363  ;;  %v347_v57 = vsel %vm85_vm0, %v1362_v51, 0.0 }
  0xcd   :  { %v1931_v54 = vpop.xlane.xlu0 %177  ;;  %1373 = vpow2.f32 %v272_v55  ;;  %342 = vadd.xlane.f32.xlu1 %v341_v35  ;;  %v344_v63 = vsel %vm85_vm0, %v1364_v49, 0.0 }
  0xce   :  { %2994 = vst [vmem:[#allocation29_spill] sm:$0xff] %v1931_v54  ;;  %v212_v56 = vsub.f32 %v1778_v60, %v1931_v54  ;;  %1375 = vpow2.f32 %v270_v48  ;;  %345 = vadd.xlane.f32.xlu0 %v344_v63 }
  0xcf   :  { %v1366_v3 = vpop.eup %1365 }
  0xd0   :  { %v274_v7 = vmul.f32 1.442695, %v212_v56  ;;  %v1368_v44 = vpop.eup %1367  ;;  %v353_v52 = vsel %vm85_vm0, %v1366_v3, 0.0  ;;  %v55_v3 = vld [vmem:[%s2941_s1 + $0x10] sm:$0xff] }
  0xd1   :  { %348 = vadd.xlane.f32.xlu1 %v347_v57  ;;  %v350_v31 = vsel %vm85_vm0, %v1368_v44, 0.0  ;;  %v54_v57 = vld [vmem:[%s2941_s1 + $0x8] sm:$0xff]  ;;  %v56_v44 = vld [vmem:[%s2941_s1 + $0x18] sm:$0xff] }
  0xd2   :  { %1377 = vpow2.f32 %v274_v7  ;;  %351 = vadd.xlane.f32.xlu0 %v350_v31  ;;  %v53_v7 = vld [vmem:[%s2941_s1] sm:$0xff]  ;;  %v62_v31 = vld [vmem:[%s2941_s1 + $0x48] sm:$0xff] }
  0xd3   :  { %v1370_v53 = vpop.eup %1369 }
  0xd4   :  { %v1372_v34 = vpop.eup %1371  ;;  %v359_v35 = vsel %vm85_vm0, %v1370_v53, 0.0  ;;  %v64_v53 = vld [vmem:[%s2941_s1 + $0x58] sm:$0xff] }
  0xd5   :  { %354 = vadd.xlane.f32.xlu1 %v353_v52  ;;  %v356_v60 = vsel %vm85_vm0, %v1372_v34, 0.0  ;;  %v57_v52 = vld [vmem:[%s2941_s1 + $0x20] sm:$0xff]  ;;  %v58_v34 = vld [vmem:[%s2941_s1 + $0x28] sm:$0xff] }
  0xd6   :  { %357 = vadd.xlane.f32.xlu0 %v356_v60  ;;  %v66_v60 = vld [vmem:[%s2941_s1 + $0x68] sm:$0xff] }
  0xd7   :  { %v1374_v51 = vpop.eup %1373 }
  0xd8   :  { %v1376_v55 = vpop.eup %1375  ;;  %v365_v49 = vsel %vm85_vm0, %v1374_v51, 0.0  ;;  %v70_v51 = vld [vmem:[%s2941_s1 + $0x88] sm:$0xff] }
  0xd9   :  { %360 = vadd.xlane.f32.xlu1 %v359_v35  ;;  %v362_v48 = vsel %vm85_vm0, %v1376_v55, 0.0  ;;  %v68_v35 = vld [vmem:[%s2941_s1 + $0x78] sm:$0xff]  ;;  %v1977_v55 = vpop.xlane.xlu1 %180 }
  0xda   :  { %363 = vadd.xlane.f32.xlu0 %v362_v48  ;;  %2995 = vst [vmem:[#allocation30_spill] sm:$0xff] %v1977_v55  ;;  %v72_v48 = vld [vmem:[%s2941_s1 + $0x98] sm:$0xff] }
  0xdc   :  { %v1378_v56 = vpop.eup %1377 }
  0xdd   :  { %v368_v63 = vsel %vm85_vm0, %v1378_v56, 0.0  ;;  %366 = vadd.xlane.f32.xlu1 %v365_v49  ;;  %v213_v49 = vsub.f32 %v1783_v61, %v1977_v55  ;;  %v74_v56 = vld [vmem:[%s2941_s1 + $0xa8] sm:$0xff]  ;;  %v80_v61 = vld [vmem:[%s2941_s1 + $0xd8] sm:$0xff] }
  0xde   :  { %369 = vadd.xlane.f32.xlu0 %v368_v63 }
  0xdf   :  { %v276_v63 = vmul.f32 1.442695, %v213_v49 }
  0xe1   :  { %1379 = vpow2.f32 %v276_v63 }
  0xee   :  { %380 = vperm.xlu1 %1316, %v54_v57   ;;  %v76_v57 = vld [vmem:[%s2941_s1 + $0xb8] sm:$0xff] }
  0xf2   :  { %383 = vperm.xlu1 %1316, %v55_v3   ;;  %v78_v3 = vld [vmem:[%s2941_s1 + $0xc8] sm:$0xff] }
  0xf4   :  { %377 = vperm.xlu0 %1315, %v53_v7   ;;  %v1380_v7 = vpop.eup %1379 }
  0xf6   :  { %386 = vperm.xlu1 %1316, %v56_v44   ;;  %v82_v44 = vld [vmem:[%s2941_s1 + $0xe8] sm:$0xff] }
  0xf8   :  { %404 = vperm.xlu0 %1315, %v62_v31   ;;  %v371_v31 = vsel %vm85_vm0, %v1380_v7, 0.0 }
  0xfa   :  { %389 = vperm.xlu1 %1316, %v57_v52   ;;  %v84_v52 = vld [vmem:[%s2941_s1 + $0xf8] sm:$0xff] }
  0xfc   :  { %410 = vperm.xlu0 %1315, %v64_v53  }
  0xfe   :  { %392 = vperm.xlu1 %1316, %v58_v34   ;;  %v59_v34 = vld [vmem:[%s2941_s1 + $0x30] sm:$0xff] }
 0x100   :  { %416 = vperm.xlu0 %1315, %v66_v60  }
 0x104   :  { %422 = vperm.xlu0 %1315, %v68_v35  }
 0x108   :  { %428 = vperm.xlu0 %1315, %v70_v51   ;;  %v60_v51 = vld [vmem:[%s2941_s1 + $0x38] sm:$0xff] }
 0x10c   :  { %434 = vperm.xlu0 %1315, %v72_v48  }
 0x110   :  { %440 = vperm.xlu0 %1315, %v74_v56   ;;  %v61_v56 = vld [vmem:[%s2941_s1 + $0x40] sm:$0xff] }
 0x114   :  { %446 = vperm.xlu0 %1315, %v76_v57  }
 0x118   :  { %452 = vperm.xlu0 %1315, %v78_v3   ;;  %v63_v3 = vld [vmem:[%s2941_s1 + $0x50] sm:$0xff] }
 0x11c   :  { %458 = vperm.xlu0 %1315, %v80_v61  }
 0x120   :  { %464 = vperm.xlu0 %1315, %v82_v44   ;;  %v65_v44 = vld [vmem:[%s2941_s1 + $0x60] sm:$0xff] }
 0x122   :  { %372 = vadd.xlane.f32.xlu1 %v371_v31 }
 0x124   :  { %470 = vperm.xlu0 %1315, %v84_v52  }
 0x12e   :  { %v2003_v53 = vpop.xlane.xlu0 %279 }
 0x12f   :  { %1381 = vlog2.f32 %v2003_v53 }
 0x132   :  { %v2008_v60 = vpop.xlane.xlu1 %282  ;;  %v2010_v35 = vpop.xlane.xlu0 %285 }
 0x133   :  { %395 = vperm.xlu1 %1316, %v59_v34   ;;  %v67_v34 = vld [vmem:[%s2941_s1 + $0x70] sm:$0xff]  ;;  %1383 = vlog2.f32 %v2008_v60 }
 0x134   :  { %1385 = vlog2.f32 %v2010_v35 }
 0x136   :  { %v2015_v48 = vpop.xlane.xlu1 %288 }
 0x137   :  { %398 = vperm.xlu1 %1316, %v60_v51   ;;  %v2017_v49 = vpop.xlane.xlu0 %291  ;;  %1387 = vlog2.f32 %v2015_v48 }
 0x138   :  { %1389 = vlog2.f32 %v2017_v49 }
 0x139   :  { %v1382_v35 = vpop.eup %1381 }
 0x13a   :  { %v2022_v63 = vpop.xlane.xlu1 %294 }
 0x13b   :  { %401 = vperm.xlu1 %1316, %v61_v56   ;;  %v2024_v57 = vpop.xlane.xlu0 %297  ;;  %1391 = vlog2.f32 %v2022_v63 }
 0x13c   :  { %1393 = vlog2.f32 %v2024_v57 }
 0x13d   :  { %v1384_v48 = vpop.eup %1383 }
 0x13e   :  { %v2029_v61 = vpop.xlane.xlu1 %300  ;;  %v1386_v57 = vpop.eup %1385 }
 0x13f   :  { %407 = vperm.xlu1 %1316, %v63_v3   ;;  %v2031_v7 = vpop.xlane.xlu0 %303  ;;  %v69_v3 = vld [vmem:[%s2941_s1 + $0x80] sm:$0xff]  ;;  %1395 = vlog2.f32 %v2029_v61 }
 0x140   :  { %1397 = vlog2.f32 %v2031_v7 }
 0x141   :  { %v1388_v61 = vpop.eup %1387 }
 0x142   :  { %v2036_v31 = vpop.xlane.xlu1 %306 }
 0x143   :  { %413 = vperm.xlu1 %1316, %v65_v44   ;;  %v2038_v52 = vpop.xlane.xlu0 %309  ;;  %v71_v44 = vld [vmem:[%s2941_s1 + $0x90] sm:$0xff]  ;;  %1399 = vlog2.f32 %v2036_v31 }
 0x144   :  { %1401 = vlog2.f32 %v2038_v52 }
 0x146   :  { %v2043_v51 = vpop.xlane.xlu1 %312 }
 0x147   :  { %419 = vperm.xlu1 %1316, %v67_v34   ;;  %v2045_v56 = vpop.xlane.xlu0 %315  ;;  %v73_v34 = vld [vmem:[%s2941_s1 + $0xa0] sm:$0xff]  ;;  %1403 = vlog2.f32 %v2043_v51 }
 0x148   :  { %1405 = vlog2.f32 %v2045_v56 }
 0x14a   :  { %v2050_v55 = vpop.xlane.xlu1 %318 }
 0x14b   :  { %425 = vperm.xlu1 %1316, %v69_v3   ;;  %v2052_v54 = vpop.xlane.xlu0 %321  ;;  %v75_v3 = vld [vmem:[%s2941_s1 + $0xb0] sm:$0xff]  ;;  %1407 = vlog2.f32 %v2050_v55  ;;  %v802_v55 = vmul.f32 0.6931472, %v1384_v48 }
 0x14c   :  { %1409 = vlog2.f32 %v2052_v54 }
 0x14e   :  { %v2057_v19 = vpop.xlane.xlu1 %324 }
 0x14f   :  { %431 = vperm.xlu1 %1316, %v71_v44   ;;  %v2062_v43 = vpop.xlane.xlu0 %327  ;;  %v77_v44 = vld [vmem:[%s2941_s1 + $0xc0] sm:$0xff]  ;;  %1411 = vlog2.f32 %v2057_v19 }
 0x150   :  { %1413 = vlog2.f32 %v2062_v43 }
 0x152   :  { %v2064_v38 = vpop.xlane.xlu1 %330 }
 0x153   :  { %437 = vperm.xlu1 %1316, %v73_v34   ;;  %v2071_v10 = vpop.xlane.xlu0 %333  ;;  %v79_v34 = vld [vmem:[%s2941_s1 + $0xd0] sm:$0xff]  ;;  %1415 = vlog2.f32 %v2064_v38 }
 0x154   :  { %1417 = vlog2.f32 %v2071_v10 }
 0x156   :  { %v2069_v26 = vpop.xlane.xlu1 %336 }
 0x157   :  { %443 = vperm.xlu1 %1316, %v75_v3   ;;  %v2081_v62 = vpop.xlane.xlu0 %339  ;;  %v81_v3 = vld [vmem:[%s2941_s1 + $0xe0] sm:$0xff]  ;;  %1419 = vlog2.f32 %v2069_v26 }
 0x15a   :  { %v2076_v46 = vpop.xlane.xlu1 %342 }
 0x15b   :  { %449 = vperm.xlu1 %1316, %v77_v44   ;;  %v2090_v47 = vpop.xlane.xlu0 %345  ;;  %v83_v44 = vld [vmem:[%s2941_s1 + $0xf0] sm:$0xff] }
 0x15e   :  { %v2083_v11 = vpop.xlane.xlu1 %348 }
 0x15f   :  { %455 = vperm.xlu1 %1316, %v79_v34   ;;  %v2097_v23 = vpop.xlane.xlu0 %351 }
 0x162   :  { %v2088_v14 = vpop.xlane.xlu1 %354 }
 0x163   :  { %2996 = vst [vmem:[#allocation31_spill] sm:$0xff] %v2088_v14  ;;  %461 = vperm.xlu1 %1316, %v81_v3   ;;  %v2107_v3 = vpop.xlane.xlu0 %357 }
 0x164   :  { %2999 = vst [vmem:[#allocation34_spill] sm:$0xff] %v2107_v3 }
 0x166   :  { %v2095_v50 = vpop.xlane.xlu1 %360 }
 0x167   :  { %2997 = vst [vmem:[#allocation32_spill] sm:$0xff] %v2095_v50  ;;  %467 = vperm.xlu1 %1316, %v83_v44  }
 0x16a   :  { %v2099_v34 = vpop.xlane.xlu1 %366 }
 0x16b   :  { %2998 = vst [vmem:[#allocation33_spill] sm:$0xff] %v2099_v34  ;;  %v2122_v34 = vpop.xlane.xlu0 %363 }
 0x16c   :  { %3000 = vst [vmem:[#allocation35_spill] sm:$0xff] %v2122_v34 }
 0x16e   :  { %v2103_v59 = vpop.permute.xlu1 %380 }
 0x16f   :  { %vm473_vm1 = vcmp.eq.s32.totalorder %v2101_v58, %v2103_v59 }
 0x170   :  { %v505_v39 = vsel %vm473_vm1, %v1578_v2, 0.0 }
 0x171   :  { %v539_v44 = vsel %vm85_vm0, %v505_v39, 0.0  ;;  %v2129_v39 = vpop.xlane.xlu0 %369 }
 0x172   :  { %v2114_v50 = vpop.permute.xlu1 %383  ;;  %540 = vadd.xlane.f32.xlu0 %v539_v44  ;;  %3001 = vst [vmem:[#allocation36_spill] sm:$0xff] %v2129_v39 }
 0x173   :  { %vm474_vm2 = vcmp.eq.s32.totalorder %v2101_v58, %v2114_v50 }
 0x174   :  { %v506_v22 = vsel %vm474_vm2, %v1573_v1, 0.0 }
 0x175   :  { %v542_v42 = vsel %vm85_vm0, %v506_v22, 0.0  ;;  %v378_v34 = vpop.permute.xlu0 %377 }
 0x176   :  { %v2125_v3 = vpop.permute.xlu1 %386  ;;  %543 = vadd.xlane.f32.xlu0 %v542_v42  ;;  %vm472_vm4 = vcmp.eq.s32.totalorder %v2101_v58, %v378_v34 }
 0x177   :  { %v504_v42 = vsel %vm472_vm4, %v1568_v0, 0.0  ;;  %vm475_vm5 = vcmp.eq.s32.totalorder %v2101_v58, %v2125_v3 }
 0x178   :  { %v536_v22 = vsel %vm85_vm0, %v504_v42, 0.0 }
 0x179   :  { %v2170_v14 = vpop.permute.xlu0 %404 }
 0x17a   :  { %v2127_v2 = vpop.permute.xlu1 %389  ;;  %vm481_vm8 = vcmp.eq.s32.totalorder %v2101_v58, %v2170_v14 }
 0x17b   :  { %vm476_vm3 = vcmp.eq.s32.totalorder %v2101_v58, %v2127_v2 }
 0x17c   :  { %v508_v44 = vsel %vm476_vm3, %v1601_v9, 0.0  ;;  %v507_v9 = vsel %vm475_vm5, %v1587_v5, 0.0 }
 0x17d   :  { %v548_v1 = vsel %vm85_vm0, %v508_v44, 0.0  ;;  %v545_v44 = vsel %vm85_vm0, %v507_v9, 0.0 }
 0x17e   :  { %549 = vadd.xlane.f32.xlu0 %v548_v1  ;;  %v2145_v39 = vpop.permute.xlu1 %392 }
 0x17f   :  { %vm477_vm6 = vcmp.eq.s32.totalorder %v2101_v58, %v2145_v39 }
 0x180   :  { %v509_v0 = vsel %vm477_vm6, %v1596_v8, 0.0 }
 0x181   :  { %v551_v1 = vsel %vm85_vm0, %v509_v0, 0.0  ;;  %v513_v0 = vsel %vm481_vm8, %v1624_v16, 0.0 }
 0x182   :  { %v563_v16 = vsel %vm85_vm0, %v513_v0, 0.0 }
 0x18b   :  { %537 = vadd.xlane.f32.xlu1 %v536_v22 }
 0x18f   :  { %546 = vadd.xlane.f32.xlu1 %v545_v44 }
 0x193   :  { %552 = vadd.xlane.f32.xlu1 %v551_v1 }
 0x1af   :  { %v2159_v42 = vpop.xlane.xlu1 %372 }
 0x1b0   :  { %3002 = vst [vmem:[#allocation37_spill] sm:$0xff] %v2159_v42 }
 0x1b3   :  { %v2161_v22 = vpop.permute.xlu1 %395 }
 0x1b4   :  { %vm478_vm7 = vcmp.eq.s32.totalorder %v2101_v58, %v2161_v22 }
 0x1b5   :  { %v510_v5 = vsel %vm478_vm7, %v1615_v13, 0.0 }
 0x1b6   :  { %v554_v9 = vsel %vm85_vm0, %v510_v5, 0.0 }
 0x1b7   :  { %v2172_v8 = vpop.permute.xlu1 %398  ;;  %555 = vadd.xlane.f32.xlu0 %v554_v9 }
 0x1b8   :  { %vm479_vm9 = vcmp.eq.s32.totalorder %v2101_v58, %v2172_v8 }
 0x1b9   :  { %v511_v44 = vsel %vm479_vm9, %v1610_v12, 0.0  ;;  %v2198_v12 = vld [vmem:[%s2942_s2] ss:$0 sm:$0xff] }
 0x1ba   :  { %v557_v13 = vsel %vm85_vm0, %v511_v44, 0.0  ;;  %v639_v44 = vsel %vm472_vm4, %v2198_v12, 0.0  ;;  %v641_v59 = vsel %vm474_vm2, %v2198_v12, 0.0  ;;  %v642_v50 = vsel %vm475_vm5, %v2198_v12, 0.0 }
 0x1bb   :  { %v2187_v1 = vpop.permute.xlu1 %401  ;;  %558 = vadd.xlane.f32.xlu1 %v557_v13  ;;  %v2205_v13 = vpop.permute.xlu0 %410  ;;  %v671_v0 = vsel %vm85_vm0, %v639_v44, 0.0  ;;  %v644_v2 = vsel %vm477_vm6, %v2198_v12, 0.0  ;;  %v645_v39 = vsel %vm478_vm7, %v2198_v12, 0.0 }
 0x1bc   :  { %vm480_vm10 = vcmp.eq.s32.totalorder %v2101_v58, %v2187_v1  ;;  %vm483_vm11 = vcmp.eq.s32.totalorder %v2101_v58, %v2205_v13  ;;  %v648_v1 = vsel %vm481_vm8, %v2198_v12, 0.0 }
 0x1bd   :  { %v512_v5 = vsel %vm480_vm10, %v1629_v17, 0.0 }
 0x1be   :  { %v560_v9 = vsel %vm85_vm0, %v512_v5, 0.0  ;;  %v515_v5 = vsel %vm483_vm11, %v1638_v20, 0.0 }
 0x1bf   :  { %v2207_v42 = vpop.permute.xlu1 %407  ;;  %561 = vadd.xlane.f32.xlu0 %v560_v9  ;;  %564 = vadd.xlane.f32.xlu1 %v563_v16  ;;  %v640_v16 = vsel %vm473_vm1, %v2198_v12, 0.0  ;;  %v569_v44 = vsel %vm85_vm0, %v515_v5, 0.0 }
 0x1c0   :  { %vm482_vm12 = vcmp.eq.s32.totalorder %v2101_v58, %v2207_v42  ;;  %v650_v42 = vsel %vm483_vm11, %v2198_v12, 0.0 }
 0x1c1   :  { %v514_v17 = vsel %vm482_vm12, %v1643_v21, 0.0  ;;  %v674_v21 = vsel %vm85_vm0, %v640_v16, 0.0  ;;  %v680_v16 = vsel %vm85_vm0, %v642_v50, 0.0  ;;  %v649_v14 = vsel %vm482_vm12, %v2198_v12, 0.0 }
 0x1c2   :  { %v566_v34 = vsel %vm85_vm0, %v514_v17, 0.0  ;;  %v2233_v17 = vpop.permute.xlu0 %416 }
 0x1c3   :  { %v2223_v9 = vpop.permute.xlu1 %413  ;;  %567 = vadd.xlane.f32.xlu0 %v566_v34  ;;  %672 = vadd.xlane.f32.xlu1 %v671_v0  ;;  %vm485_vm14 = vcmp.eq.s32.totalorder %v2101_v58, %v2233_v17  ;;  %v677_v0 = vsel %vm85_vm0, %v641_v59, 0.0 }
 0x1c4   :  { %vm484_vm13 = vcmp.eq.s32.totalorder %v2101_v58, %v2223_v9  ;;  %v652_v9 = vsel %vm485_vm14, %v2198_v12, 0.0 }
 0x1c5   :  { %v516_v20 = vsel %vm484_vm13, %v1657_v25, 0.0  ;;  %v517_v25 = vsel %vm485_vm14, %v1652_v24, 0.0  ;;  %v651_v13 = vsel %vm484_vm13, %v2198_v12, 0.0 }
 0x1c6   :  { %v572_v5 = vsel %vm85_vm0, %v516_v20, 0.0  ;;  %v2265_v24 = vpop.permute.xlu0 %422 }
 0x1c7   :  { %675 = vadd.xlane.f32.xlu0 %v674_v21  ;;  %570 = vadd.xlane.f32.xlu1 %v569_v44  ;;  %v2245_v34 = vpop.permute.xlu1 %419  ;;  %v575_v21 = vsel %vm85_vm0, %v517_v25, 0.0  ;;  %v643_v44 = vsel %vm476_vm3, %v2198_v12, 0.0  ;;  %vm487_vm1 = vcmp.eq.s32.totalorder %v2101_v58, %v2265_v24 }
 0x1c8   :  { %vm486_vm15 = vcmp.eq.s32.totalorder %v2101_v58, %v2245_v34  ;;  %v683_v59 = vsel %vm85_vm0, %v643_v44, 0.0 }
 0x1c9   :  { %v518_v3 = vsel %vm486_vm15, %v1671_v29, 0.0  ;;  %v519_v29 = vsel %vm487_vm1, %v1666_v28, 0.0  ;;  %v653_v17 = vsel %vm486_vm15, %v2198_v12, 0.0 }
 0x1ca   :  { %v581_v25 = vsel %vm85_vm0, %v519_v29, 0.0  ;;  %v2289_v50 = vpop.permute.xlu0 %428 }
 0x1cb   :  { %678 = vadd.xlane.f32.xlu0 %v677_v0  ;;  %573 = vadd.xlane.f32.xlu1 %v572_v5  ;;  %v2273_v20 = vpop.permute.xlu1 %425  ;;  %v578_v0 = vsel %vm85_vm0, %v518_v3, 0.0  ;;  %v686_v5 = vsel %vm85_vm0, %v644_v2, 0.0  ;;  %vm489_vm3 = vcmp.eq.s32.totalorder %v2101_v58, %v2289_v50 }
 0x1cc   :  { %vm488_vm2 = vcmp.eq.s32.totalorder %v2101_v58, %v2273_v20  ;;  %v521_v22 = vsel %vm489_vm3, %v1680_v32, 0.0  ;;  %v647_v32 = vsel %vm480_vm10, %v2198_v12, 0.0 }
 0x1cd   :  { %v520_v28 = vsel %vm488_vm2, %v1685_v33, 0.0  ;;  %v646_v33 = vsel %vm479_vm9, %v2198_v12, 0.0  ;;  %v695_v29 = vsel %vm85_vm0, %v647_v32, 0.0  ;;  %v655_v24 = vsel %vm488_vm2, %v2198_v12, 0.0 }
 0x1ce   :  { %v584_v44 = vsel %vm85_vm0, %v520_v28, 0.0  ;;  %v692_v3 = vsel %vm85_vm0, %v646_v33, 0.0  ;;  %v704_v33 = vsel %vm85_vm0, %v650_v42, 0.0  ;;  %v1511_v42 = vld [vmem:[%s2940_s0 + $0xc8] sm:$0xff] }
 0x1cf   :  { %681 = vadd.xlane.f32.xlu0 %v680_v16  ;;  %576 = vadd.xlane.f32.xlu1 %v575_v21  ;;  %v2301_v16 = vpop.permute.xlu1 %431  ;;  %v689_v21 = vsel %vm85_vm0, %v645_v39, 0.0 }
 0x1d0   :  { %vm490_vm4 = vcmp.eq.s32.totalorder %v2101_v58, %v2301_v16 }
 0x1d1   :  { %v522_v8 = vsel %vm490_vm4, %v1699_v37, 0.0  ;;  %v657_v50 = vsel %vm490_vm4, %v2198_v12, 0.0 }
 0x1d3   :  { %684 = vadd.xlane.f32.xlu0 %v683_v59  ;;  %579 = vadd.xlane.f32.xlu1 %v578_v0  ;;  %v587_v59 = vsel %vm85_vm0, %v521_v22, 0.0  ;;  %v2317_v0 = vpop.permute.xlu0 %434  ;;  %v2329_v2 = vpop.permute.xlu1 %437 }
 0x1d4   :  { %vm491_vm5 = vcmp.eq.s32.totalorder %v2101_v58, %v2317_v0  ;;  %vm492_vm6 = vcmp.eq.s32.totalorder %v2101_v58, %v2329_v2 }
 0x1d5   :  { %v523_v37 = vsel %vm491_vm5, %v1694_v36, 0.0  ;;  %v524_v36 = vsel %vm492_vm6, %v1713_v41, 0.0  ;;  %v658_v16 = vsel %vm491_vm5, %v2198_v12, 0.0  ;;  %v659_v0 = vsel %vm492_vm6, %v2198_v12, 0.0 }
 0x1d6   :  { %v593_v39 = vsel %vm85_vm0, %v523_v37, 0.0  ;;  %v596_v22 = vsel %vm85_vm0, %v524_v36, 0.0 }
 0x1d7   :  { %687 = vadd.xlane.f32.xlu0 %v686_v5  ;;  %582 = vadd.xlane.f32.xlu1 %v581_v25  ;;  %v590_v5 = vsel %vm85_vm0, %v522_v8, 0.0  ;;  %v698_v25 = vsel %vm85_vm0, %v648_v1, 0.0  ;;  %v2345_v28 = vpop.permute.xlu0 %440  ;;  %v707_v8 = vsel %vm85_vm0, %v651_v13, 0.0  ;;  %v710_v1 = vsel %vm85_vm0, %v652_v9, 0.0 }
 0x1d8   :  { %vm493_vm7 = vcmp.eq.s32.totalorder %v2101_v58, %v2345_v28  ;;  %v719_v9 = vsel %vm85_vm0, %v655_v24, 0.0  ;;  %v728_v24 = vsel %vm85_vm0, %v658_v16, 0.0 }
 0x1d9   :  { %v525_v41 = vsel %vm493_vm7, %v1708_v40, 0.0  ;;  %v660_v2 = vsel %vm493_vm7, %v2198_v12, 0.0 }
 0x1db   :  { %690 = vadd.xlane.f32.xlu0 %v689_v21  ;;  %585 = vadd.xlane.f32.xlu1 %v584_v44  ;;  %v2357_v21 = vpop.permute.xlu1 %443  ;;  %v701_v44 = vsel %vm85_vm0, %v649_v14, 0.0 }
 0x1dc   :  { %vm494_vm8 = vcmp.eq.s32.totalorder %v2101_v58, %v2357_v21 }
 0x1dd   :  { %v526_v40 = vsel %vm494_vm8, %v1727_v45, 0.0  ;;  %v1509_v45 = vld [vmem:[%s2940_s0 + $0xb8] sm:$0xff]  ;;  %v661_v28 = vsel %vm494_vm8, %v2198_v12, 0.0 }
 0x1df   :  { %693 = vadd.xlane.f32.xlu0 %v692_v3  ;;  %588 = vadd.xlane.f32.xlu1 %v587_v59  ;;  %v599_v3 = vsel %vm85_vm0, %v525_v41, 0.0  ;;  %v2373_v59 = vpop.permute.xlu0 %446  ;;  %v2385_v32 = vpop.permute.xlu1 %449 }
 0x1e0   :  { %vm495_vm9 = vcmp.eq.s32.totalorder %v2101_v58, %v2373_v59  ;;  %vm496_vm10 = vcmp.eq.s32.totalorder %v2101_v58, %v2385_v32 }
 0x1e1   :  { %v663_v59 = vsel %vm496_vm10, %v2198_v12, 0.0 }
 0x1e2   :  { %v743_v21 = vsel %vm85_vm0, %v663_v59, 0.0 }
 0x1e3   :  { %696 = vadd.xlane.f32.xlu0 %v695_v29  ;;  %591 = vadd.xlane.f32.xlu1 %v590_v5  ;;  %v602_v29 = vsel %vm85_vm0, %v526_v40, 0.0  ;;  %v527_v5 = vsel %vm495_vm9, %v1509_v45, 0.0  ;;  %v2417_v36 = vpop.permute.xlu1 %455  ;;  %v1512_v40 = vld [vmem:[%s2940_s0 + $0xd0] sm:$0xff]  ;;  %v656_v45 = vsel %vm489_vm3, %v2198_v12, 0.0 }
 0x1e4   :  { %v605_v37 = vsel %vm85_vm0, %v527_v5, 0.0  ;;  %vm498_vm12 = vcmp.eq.s32.totalorder %v2101_v58, %v2417_v36  ;;  %v1513_v5 = vld [vmem:[%s2940_s0 + $0xd8] sm:$0xff] }
 0x1e7   :  { %699 = vadd.xlane.f32.xlu0 %v698_v25  ;;  %594 = vadd.xlane.f32.xlu1 %v593_v39  ;;  %v2403_v25 = vpop.permute.xlu0 %452  ;;  %v1510_v39 = vld [vmem:[%s2940_s0 + $0xc0] sm:$0xff] }
 0x1e8   :  { %v528_v14 = vsel %vm496_vm10, %v1510_v39, 0.0  ;;  %vm497_vm11 = vcmp.eq.s32.totalorder %v2101_v58, %v2403_v25  ;;  %v665_v25 = vsel %vm498_vm12, %v2198_v12, 0.0 }
 0x1e9   :  { %v608_v34 = vsel %vm85_vm0, %v528_v14, 0.0  ;;  %v529_v41 = vsel %vm497_vm11, %v1511_v42, 0.0  ;;  %v1514_v14 = vld [vmem:[%s2940_s0 + $0xe0] sm:$0xff]  ;;  %v749_v32 = vsel %vm85_vm0, %v665_v25, 0.0 }
 0x1eb   :  { %702 = vadd.xlane.f32.xlu0 %v701_v44  ;;  %597 = vadd.xlane.f32.xlu1 %v596_v22  ;;  %v713_v44 = vsel %vm85_vm0, %v653_v17, 0.0  ;;  %v654_v22 = vsel %vm487_vm1, %v2198_v12, 0.0  ;;  %v2435_v13 = vpop.permute.xlu0 %458 }
 0x1ec   :  { %vm499_vm13 = vcmp.eq.s32.totalorder %v2101_v58, %v2435_v13 }
 0x1ed   :  { %v666_v16 = vsel %vm499_vm13, %v2198_v12, 0.0 }
 0x1ef   :  { %705 = vadd.xlane.f32.xlu0 %v704_v33  ;;  %600 = vadd.xlane.f32.xlu1 %v599_v3  ;;  %v716_v33 = vsel %vm85_vm0, %v654_v22, 0.0  ;;  %v611_v3 = vsel %vm85_vm0, %v529_v41, 0.0  ;;  %v465_v39 = vpop.permute.xlu0 %464  ;;  %v725_v22 = vsel %vm85_vm0, %v657_v50, 0.0  ;;  %v1515_v41 = vld [vmem:[%s2940_s0 + $0xe8] sm:$0xff]  ;;  %v662_v50 = vsel %vm495_vm9, %v2198_v12, 0.0 }
 0x1f0   :  { %vm501_vm15 = vcmp.eq.s32.totalorder %v2101_v58, %v465_v39 }
 0x1f3   :  { %708 = vadd.xlane.f32.xlu0 %v707_v8  ;;  %603 = vadd.xlane.f32.xlu1 %v602_v29  ;;  %v530_v8 = vsel %vm498_vm12, %v1512_v40, 0.0  ;;  %v2449_v29 = vpop.permute.xlu1 %461 }
 0x1f4   :  { %v614_v20 = vsel %vm85_vm0, %v530_v8, 0.0  ;;  %vm500_vm14 = vcmp.eq.s32.totalorder %v2101_v58, %v2449_v29  ;;  %v1516_v8 = vld [vmem:[%s2940_s0 + $0xf0] sm:$0xff] }
 0x1f5   :  { %v667_v13 = vsel %vm500_vm14, %v2198_v12, 0.0 }
 0x1f6   :  { %v755_v36 = vsel %vm85_vm0, %v667_v13, 0.0  ;;  %v3004_v13 = vld [vmem:[#allocation34_spill] sm:$0xff] }
 0x1f7   :  { %711 = vadd.xlane.f32.xlu0 %v710_v1  ;;  %606 = vadd.xlane.f32.xlu1 %v605_v37  ;;  %v531_v1 = vsel %vm499_vm13, %v1513_v5, 0.0  ;;  %v722_v37 = vsel %vm85_vm0, %v656_v45, 0.0  ;;  %v1517_v5 = vld [vmem:[%s2940_s0 + $0xf8] sm:$0xff]  ;;  %s1544_s0 = smov [#allocation2]  }
 0x1f8   :  { %v617_v17 = vsel %vm85_vm0, %v531_v1, 0.0  ;;  %s1303_s23 = sshll.u32 %s1544_s0, 4  ;;  %s1304_s23 = int_to_ptr.vmem [resolvable:$true] %s1303_s23 }
 0x1f9   :  { %s1518_s24 = scalar_lea.vmem %s1304_s23, 16  ;;  %s1522_s25 = scalar_lea.vmem %s1304_s23, 32 }
 0x1fa   :  { %p1519_p0 = scmp.ne.s32.totalorder %s1304_s23, %s1518_s24  ;;  %p1523_p1 = scmp.lt.s32.totalorder %s1304_s23, %s1304_s23 }
 0x1fb   :  { %714 = vadd.xlane.f32.xlu0 %v713_v44  ;;  %609 = vadd.xlane.f32.xlu1 %v608_v34  ;;  %v532_v44 = vsel %vm500_vm14, %v1514_v14, 0.0  ;;  %v468_v34 = vpop.permute.xlu1 %467  ;;  %v737_v14 = vsel %vm85_vm0, %v661_v28, 0.0  ;;  %p1524_p2 = scmp.lt.s32.totalorder %s1522_s25, %s1518_s24 }
 0x1fc   :  { %v620_v42 = vsel %vm85_vm0, %v532_v44, 0.0  ;;  %vm502_vm1 = vcmp.eq.s32.totalorder %v2101_v58, %v468_v34  ;;  %v740_v44 = vsel %vm85_vm0, %v662_v50, 0.0  ;;  %v1543_v34 = vmov 0.0  }
 0x1fd   :  { %v669_v39 = vsel %vm502_vm1, %v2198_v12, 0.0  ;;  %p1525_p3 = por %p1524_p2, %p1523_p1 }
 0x1ff   :  { %717 = vadd.xlane.f32.xlu0 %v716_v33  ;;  %612 = vadd.xlane.f32.xlu1 %v611_v3  ;;  %v533_v33 = vsel %vm501_vm15, %v1515_v41, 0.0  ;;  %v471_v3 = vpop.permute.xlu0 %470  ;;  %v752_v41 = vsel %vm85_vm0, %v666_v16, 0.0  ;;  %p1526_p4 = pnand %p1525_p3, %p1519_p0 }
 0x200   :  { %v623_v40 = vsel %vm85_vm0, %v533_v33, 0.0  ;;  %vm503_vm2 = vcmp.eq.s32.totalorder %v2101_v58, %v471_v3  ;;  %v668_v33 = vsel %vm501_vm15, %v2198_v12, 0.0 }
 0x201   :  { %v535_v1 = vsel %vm503_vm2, %v1517_v5, 0.0  ;;  %v1390_v5 = vpop.eup %1389  ;;  %1421 = vlog2.f32 %v2081_v62 }
 0x202   :  { %v1392_v7 = vpop.eup %1391  ;;  %1423 = vlog2.f32 %v2076_v46 }
 0x203   :  { %720 = vadd.xlane.f32.xlu0 %v719_v9  ;;  %615 = vadd.xlane.f32.xlu1 %v614_v20  ;;  %v534_v9 = vsel %vm502_vm1, %v1516_v8, 0.0  ;;  %v731_v20 = vsel %vm85_vm0, %v659_v0, 0.0  ;;  %v761_v0 = vsel %vm85_vm0, %v669_v39, 0.0 }
 0x204   :  { %v626_v45 = vsel %vm85_vm0, %v534_v9, 0.0  ;;  %v541_v9 = vpop.xlane.xlu0 %540 }
 0x205   :  { %v768_v31 = vsub.f32 %v541_v9, %v1797_v15  ;;  %v3006_v9 = vld [vmem:[#allocation32_spill] sm:$0xff] }
 0x207   :  { %723 = vadd.xlane.f32.xlu0 %v722_v37  ;;  %618 = vadd.xlane.f32.xlu1 %v617_v17  ;;  %v734_v37 = vsel %vm85_vm0, %v660_v2, 0.0  ;;  %v629_v17 = vsel %vm85_vm0, %v535_v1, 0.0  ;;  %v1394_v1 = vpop.eup %1393  ;;  %v2613_v15 = vsub.f32 %v768_v31, %v802_v55  ;;  %1425 = vlog2.f32 %v2090_v47 }
 0x208   :  { %v806_v47 = vmul.f32 0.6931472, %v1388_v61  ;;  %v3008_v61 = vld [vmem:[#allocation5_spill] sm:$0xff] }
 0x209   :  { %v897_v62 = vmul.f32 1.442695, %v2613_v15 }
 0x20b   :  { %726 = vadd.xlane.f32.xlu0 %v725_v22  ;;  %621 = vadd.xlane.f32.xlu1 %v620_v42  ;;  %v664_v22 = vsel %vm497_vm11, %v2198_v12, 0.0 }
 0x20c   :  { %v746_v42 = vsel %vm85_vm0, %v664_v22, 0.0 }
 0x20f   :  { %729 = vadd.xlane.f32.xlu0 %v728_v24  ;;  %624 = vadd.xlane.f32.xlu1 %v623_v40  ;;  %v758_v24 = vsel %vm85_vm0, %v668_v33, 0.0  ;;  %v670_v40 = vsel %vm503_vm2, %v2198_v12, 0.0 }
 0x210   :  { %v764_v29 = vsel %vm85_vm0, %v670_v40, 0.0  ;;  %vm19_vm0 = vcmask 0  }
 0x211   :  { %20 = vst.msk [vmem:[#allocation2] sm:$0x1] %vm19_vm0, %v1543_v34 }
 0x213   :  { %732 = vadd.xlane.f32.xlu0 %v731_v20  ;;  %627 = vadd.xlane.f32.xlu1 %v626_v45  ;;  %v544_v45 = vpop.xlane.xlu0 %543 }
 0x214   :  { %v769_v56 = vsub.f32 %v544_v45, %v1791_v6 }
 0x217   :  { %735 = vadd.xlane.f32.xlu0 %v734_v37  ;;  %630 = vadd.xlane.f32.xlu1 %v629_v17  ;;  %v2566_v3 = vpop.xlane.xlu0 %549  ;;  %v2605_v37 = vpop.eup %1395  ;;  %v804_v17 = vmul.f32 0.6931472, %v1386_v57  ;;  %1427 = vlog2.f32 %v2083_v11 }
 0x218   :  { %v2562_v8 = vpop.xlane.xlu1 %537  ;;  %v2609_v54 = vpop.eup %1397  ;;  %v771_v26 = vsub.f32 %v2566_v3, %v1807_v30  ;;  %1429 = vlog2.f32 %v2097_v23 }
 0x219   :  { %v1400_v19 = vpop.eup %1399  ;;  %v767_v43 = vsub.f32 %v2562_v8, %v1789_v4  ;;  %v2623_v10 = vsub.f32 %v769_v56, %v804_v17  ;;  %v808_v4 = vmul.f32 0.6931472, %v1390_v5  ;;  %v814_v56 = vmul.f32 0.6931472, %v2605_v37 }
 0x21a   :  { %v1402_v38 = vpop.eup %1401  ;;  %v818_v17 = vmul.f32 0.6931472, %v1400_v19 }
 0x21b   :  { %738 = vadd.xlane.f32.xlu0 %v737_v14  ;;  %741 = vadd.xlane.f32.xlu1 %v740_v44  ;;  %v1404_v6 = vpop.eup %1403  ;;  %v800_v14 = vmul.f32 0.6931472, %v1382_v35  ;;  %v899_v11 = vmul.f32 1.442695, %v2623_v10 }
 0x21c   :  { %v2564_v20 = vpop.xlane.xlu1 %546  ;;  %v1406_v44 = vpop.eup %1405 }
 0x21d   :  { %v770_v22 = vsub.f32 %v2564_v20, %v1799_v18  ;;  %v1408_v59 = vpop.eup %1407  ;;  %v3003_v18 = vld [vmem:[#allocation31_spill] sm:$0xff]  ;;  %v812_v20 = vmul.f32 0.6931472, %v1394_v1 }
 0x21e   :  { %v1410_v16 = vpop.eup %1409  ;;  %1431 = vlog2.f32 %v3003_v18  ;;  %v824_v18 = vmul.f32 0.6931472, %v1406_v44 }
 0x21f   :  { %744 = vadd.xlane.f32.xlu0 %v743_v21  ;;  %747 = vadd.xlane.f32.xlu1 %v746_v42  ;;  %v2632_v21 = vsub.f32 %v767_v43, %v800_v14  ;;  %v1412_v25 = vpop.eup %1411  ;;  %1433 = vlog2.f32 %v3004_v13  ;;  %v816_v43 = vmul.f32 0.6931472, %v2609_v54  ;;  %v2681_v54 = vmul.f32 0.6931472, %v1408_v59 }
 0x220   :  { %v2568_v2 = vpop.xlane.xlu1 %552  ;;  %v1414_v33 = vpop.eup %1413  ;;  %1435 = vpow2.f32 %v897_v62  ;;  %v2685_v13 = vmul.f32 0.6931472, %v1412_v25 }
 0x221   :  { %v772_v46 = vsub.f32 %v2568_v2, %v1805_v27  ;;  %v2646_v27 = vsub.f32 %v770_v22, %v806_v47  ;;  %v1416_v40 = vpop.eup %1415  ;;  %v895_v23 = vmul.f32 1.442695, %v2632_v21  ;;  %1437 = vlog2.f32 %v3006_v9  ;;  %v3011_v9 = vld [vmem:[#allocation10_spill] sm:$0xff] }
 0x222   :  { %v1418_v8 = vpop.eup %1417  ;;  %1439 = vpow2.f32 %v899_v11  ;;  %v822_v22 = vmul.f32 0.6931472, %v1404_v6  ;;  %v3010_v6 = vld [vmem:[#allocation7_spill] sm:$0xff] }
 0x223   :  { %750 = vadd.xlane.f32.xlu0 %v749_v32  ;;  %753 = vadd.xlane.f32.xlu1 %v752_v41  ;;  %v2643_v32 = vsub.f32 %v771_v26, %v808_v4  ;;  %v810_v41 = vmul.f32 0.6931472, %v1392_v7  ;;  %v1420_v45 = vpop.eup %1419  ;;  %v901_v34 = vmul.f32 1.442695, %v2646_v27  ;;  %v820_v4 = vmul.f32 0.6931472, %v1402_v38 }
 0x224   :  { %v1422_v2 = vpop.eup %1421 }
 0x225   :  { %v2651_v39 = vsub.f32 %v772_v46, %v810_v41  ;;  %v903_v3 = vmul.f32 1.442695, %v2643_v32  ;;  %v1424_v48 = vpop.eup %1423  ;;  %v3009_v46 = vld [vmem:[#allocation8_spill] sm:$0xff]  ;;  %v2683_v41 = vmul.f32 0.6931472, %v1410_v16 }
 0x226   :  { %v1426_v1 = vpop.eup %1425  ;;  %v2699_v16 = vmul.f32 0.6931472, %v1422_v2 }
 0x227   :  { %756 = vadd.xlane.f32.xlu0 %v755_v36  ;;  %759 = vadd.xlane.f32.xlu1 %v758_v24  ;;  %v3005_v36 = vld [vmem:[#allocation6_spill] sm:$0xff]  ;;  %v905_v57 = vmul.f32 1.442695, %v2651_v39  ;;  %v1428_v55 = vpop.eup %1427  ;;  %v2713_v2 = vmul.f32 0.6931472, %v1426_v1 }
 0x228   :  { %v1430_v26 = vpop.eup %1429 }
 0x229   :  { %v1432_v62 = vpop.eup %1431 }
 0x22a   :  { %v1434_v19 = vpop.eup %1433 }
 0x22b   :  { %762 = vadd.xlane.f32.xlu0 %v761_v0  ;;  %765 = vadd.xlane.f32.xlu1 %v764_v29  ;;  %v1436_v38 = vpop.eup %1435 }
 0x22c   :  { %v1438_v44 = vpop.eup %1437 }
 0x22d   :  { %v1440_v25 = vpop.eup %1439 }
 0x244   :  { %v2574_v58 = vpop.xlane.xlu0 %555 }
 0x245   :  { %v773_v24 = vsub.f32 %v2574_v58, %v3005_v36  ;;  %v3007_v58 = vld [vmem:[#allocation35_spill] sm:$0xff] }
 0x246   :  { %1441 = vlog2.f32 %v3007_v58 }
 0x247   :  { %v2661_v35 = vsub.f32 %v773_v24, %v812_v20  ;;  %1443 = vpow2.f32 %v895_v23  ;;  %v2689_v24 = vmul.f32 0.6931472, %v1414_v33  ;;  %v2691_v23 = vmul.f32 0.6931472, %v1416_v40 }
 0x248   :  { %v2576_v12 = vpop.xlane.xlu1 %558  ;;  %1445 = vpow2.f32 %v903_v3  ;;  %v2697_v20 = vmul.f32 0.6931472, %v1420_v45  ;;  %v960_v45 = vsub.f32 1.0, %v1436_v38  ;;  %v2728_v38 = vmul.f32 0.6931472, %v1432_v62 }
 0x249   :  { %v774_v5 = vsub.f32 %v2576_v12, %v3008_v61  ;;  %1447 = vpow2.f32 %v901_v34  ;;  %v907_v14 = vmul.f32 1.442695, %v2661_v35  ;;  %v2710_v34 = vmul.f32 0.6931472, %v1424_v48 }
 0x24a   :  { %1449 = vpow2.f32 %v905_v57  ;;  %v2715_v61 = vmul.f32 0.6931472, %v1428_v55  ;;  %v2724_v48 = vmul.f32 0.6931472, %v1434_v19  ;;  %v992_v62 = vmul.f32 %v960_v45, %v960_v45 }
 0x24b   :  { %v2673_v12 = vsub.f32 %v774_v5, %v814_v56  ;;  %1451 = vpow2.f32 %v907_v14  ;;  %v2717_v56 = vmul.f32 0.6931472, %v1430_v26  ;;  %v3015_v14 = vld [vmem:[#allocation12_spill] sm:$0xff] }
 0x24c   :  { %v2583_v53 = vpop.xlane.xlu1 %564  ;;  %v2585_v60 = vpop.xlane.xlu0 %561  ;;  %3016 = vst [vmem:[#allocation31_spill] sm:$0xff] %v2724_v48 }
 0x24d   :  { %v775_v47 = vsub.f32 %v2585_v60, %v3009_v46  ;;  %v776_v36 = vsub.f32 %v2583_v53, %v3010_v6  ;;  %v2693_v60 = vmul.f32 0.6931472, %v1418_v8  ;;  %v909_v3 = vmul.f32 1.442695, %v2673_v12  ;;  %v3012_v53 = vld [vmem:[#allocation9_spill] sm:$0xff] }
 0x24e   :  { %v961_v6 = vsub.f32 1.0, %v1440_v25 }
 0x24f   :  { %v2702_v58 = vsub.f32 %v775_v47, %v816_v43  ;;  %v3014_v43 = vld [vmem:[#allocation36_spill] sm:$0xff] }
 0x250   :  { %v2591_v49 = vpop.xlane.xlu1 %672  ;;  %v2593_v63 = vpop.xlane.xlu0 %567 }
 0x251   :  { %v777_v59 = vsub.f32 %v2593_v63, %v3011_v9  ;;  %v1442_v57 = vpop.eup %1441  ;;  %v3013_v63 = vld [vmem:[#allocation33_spill] sm:$0xff]  ;;  %v911_v55 = vmul.f32 1.442695, %v2702_v58  ;;  %v1023_v45 = vsub.f32 0.0, %v2591_v49 }
 0x252   :  { %1453 = vlog2.f32 %v3013_v63  ;;  %v1444_v5 = vpop.eup %1443  ;;  %v2739_v19 = vmul.f32 0.6931472, %v1442_v57 }
 0x253   :  { %1455 = vlog2.f32 %v3014_v43  ;;  %v2726_v47 = vsub.f32 %v777_v59, %v820_v4  ;;  %v1446_v1 = vpop.eup %1445  ;;  %v3019_v4 = vld [vmem:[#allocation37_spill] sm:$0xff]  ;;  %v959_v59 = vsub.f32 1.0, %v1444_v5  ;;  %v993_v43 = vmul.f32 %v961_v6, %v961_v6 }
 0x254   :  { %v2600_v52 = vpop.xlane.xlu1 %570  ;;  %v2602_v51 = vpop.xlane.xlu0 %675  ;;  %1457 = vpow2.f32 %v909_v3  ;;  %3018 = vst [vmem:[#allocation6_spill] sm:$0xff] %v2739_v19  ;;  %v963_v19 = vsub.f32 1.0, %v1446_v1 }
 0x255   :  { %v778_v33 = vsub.f32 %v2600_v52, %v3012_v53  ;;  %v2720_v52 = vsub.f32 %v776_v36, %v818_v17  ;;  %v2737_v36 = vmul.f32 0.6931472, %v1438_v44  ;;  %1459 = vlog2.f32 %v3019_v4  ;;  %v3022_v4 = vld [vmem:[#allocation13_spill] sm:$0xff] }
 0x256   :  { %v1024_v53 = vsub.f32 0.0, %v2602_v51  ;;  %v915_v44 = vmul.f32 1.442695, %v2726_v47  ;;  %1461 = vpow2.f32 %v911_v55 }
 0x257   :  { %v2731_v26 = vsub.f32 %v778_v33, %v822_v22  ;;  %3017 = vst [vmem:[#allocation34_spill] sm:$0xff] %v2737_v36  ;;  %v913_v3 = vmul.f32 1.442695, %v2720_v52  ;;  %v3020_v33 = vld [vmem:[#allocation11_spill] sm:$0xff] }
 0x258   :  { %v2617_v50 = vpop.xlane.xlu1 %573  ;;  %v2619_v28 = vpop.xlane.xlu0 %678 }
 0x259   :  { %v779_v46 = vsub.f32 %v2617_v50, %v3015_v14  ;;  %v1448_v50 = vpop.eup %1447  ;;  %v3021_v14 = vld [vmem:[#allocation14_spill] sm:$0xff]  ;;  %v917_v5 = vmul.f32 1.442695, %v2731_v26  ;;  %v1025_v6 = vsub.f32 0.0, %v2619_v28  ;;  %1463 = vpow2.f32 %v913_v3 }
 0x25a   :  { %v1450_v25 = vpop.eup %1449  ;;  %v962_v36 = vsub.f32 1.0, %v1448_v50  ;;  %1465 = vpow2.f32 %v915_v44 }
 0x25b   :  { %v2744_v22 = vsub.f32 %v779_v46, %v824_v18  ;;  %v964_v48 = vsub.f32 1.0, %v1450_v25  ;;  %1467 = vpow2.f32 %v917_v5 }
 0x25c   :  { %v2636_v42 = vpop.xlane.xlu1 %576  ;;  %v2638_v30 = vpop.xlane.xlu0 %681 }
 0x25d   :  { %v780_v63 = vsub.f32 %v2636_v42, %v3020_v33  ;;  %v1452_v42 = vpop.eup %1451  ;;  %v991_v33 = vmul.f32 %v959_v59, %v959_v59  ;;  %v919_v1 = vmul.f32 1.442695, %v2744_v22 }
 0x25e   :  { %v1454_v55 = vpop.eup %1453  ;;  %v965_v25 = vsub.f32 1.0, %v1452_v42 }
 0x25f   :  { %v2762_v49 = vsub.f32 %v780_v63, %v2681_v54  ;;  %v2770_v28 = vpop.eup %1455  ;;  %v1055_v50 = vmul.f32 %v1023_v45, %v991_v33  ;;  %v995_v63 = vmul.f32 %v963_v19, %v963_v19  ;;  %1469 = vpow2.f32 %v919_v1  ;;  %v3024_v45 = vld [vmem:[#allocation15_spill] sm:$0xff] }
 0x260   :  { %v2653_v0 = vpop.xlane.xlu1 %579  ;;  %v2655_v29 = vpop.xlane.xlu0 %684  ;;  %v996_v19 = vmul.f32 %v964_v48, %v964_v48  ;;  %v997_v33 = vmul.f32 %v965_v25, %v965_v25 }
 0x261   :  { %v781_v57 = vsub.f32 %v2653_v0, %v3021_v14  ;;  %v1056_v0 = vmul.f32 %v1024_v53, %v992_v62  ;;  %v1057_v53 = vmul.f32 %v1025_v6, %v993_v43  ;;  %v1458_v44 = vpop.eup %1457 }
 0x262   :  { %v2784_v5 = vpop.eup %1459 }
 0x263   :  { %v2766_v14 = vsub.f32 %v781_v57, %v2683_v41  ;;  %v1027_v41 = vsub.f32 0.0, %v2655_v29  ;;  %v921_v57 = vmul.f32 1.442695, %v2762_v49  ;;  %v1087_v29 = vmul.f32 %v1055_v50, %v2632_v21  ;;  %v3025_v21 = vld [vmem:[#allocation18_spill] sm:$0xff] }
 0x264   :  { %v2666_v7 = vpop.xlane.xlu1 %582  ;;  %v2668_v31 = vpop.xlane.xlu0 %687 }
 0x265   :  { %v782_v51 = vsub.f32 %v2666_v7, %v3022_v4  ;;  %v1026_v7 = vsub.f32 0.0, %v2638_v30  ;;  %v3023_v4 = vld [vmem:[#allocation16_spill] sm:$0xff]  ;;  %v994_v30 = vmul.f32 %v962_v36, %v962_v36  ;;  %v923_v42 = vmul.f32 1.442695, %v2766_v14 }
 0x266   :  { %v1028_v43 = vsub.f32 0.0, %v2668_v31  ;;  %v1059_v1 = vmul.f32 %v1027_v41, %v995_v63  ;;  %v1462_v31 = vpop.eup %1461  ;;  %1471 = vpow2.f32 %v921_v57 }
 0x267   :  { %v2773_v62 = vsub.f32 %v782_v51, %v2685_v13  ;;  %v1058_v51 = vmul.f32 %v1026_v7, %v994_v30  ;;  %1473 = vpow2.f32 %v923_v42 }
 0x268   :  { %v2677_v11 = vpop.xlane.xlu1 %585  ;;  %v2679_v37 = vpop.xlane.xlu0 %690  ;;  %v1060_v50 = vmul.f32 %v1028_v43, %v996_v19 }
 0x269   :  { %v783_v59 = vsub.f32 %v2677_v11, %v3023_v4  ;;  %v1088_v11 = vmul.f32 %v1056_v0, %v2613_v15  ;;  %v925_v15 = vmul.f32 1.442695, %v2773_v62  ;;  %v1029_v7 = vsub.f32 0.0, %v2679_v37 }
 0x26a   :  { %v966_v4 = vsub.f32 1.0, %v1458_v44  ;;  %v2813_v44 = vmul.f32 0.6931472, %v1454_v55  ;;  %v1092_v55 = vmul.f32 %v1060_v50, %v2651_v39 }
 0x26b   :  { %v2789_v36 = vsub.f32 %v783_v59, %v2689_v24  ;;  %v1251_v30 = vadd.f32 %v1088_v11, %v1087_v29  ;;  %v1090_v59 = vmul.f32 %v1058_v51, %v2646_v27  ;;  %1475 = vpow2.f32 %v925_v15 }
 0x26c   :  { %v2706_v40 = vpop.xlane.xlu1 %588  ;;  %v2708_v8 = vpop.xlane.xlu0 %693  ;;  %v1091_v27 = vmul.f32 %v1059_v1, %v2643_v32  ;;  %v1061_v57 = vmul.f32 %v1029_v7, %v997_v33  ;;  %v998_v42 = vmul.f32 %v966_v4, %v966_v4 }
 0x26d   :  { %v784_v13 = vsub.f32 %v2706_v40, %v3024_v45  ;;  %v1089_v40 = vmul.f32 %v1057_v53, %v2623_v10  ;;  %v927_v25 = vmul.f32 1.442695, %v2789_v36  ;;  %v1464_v10 = vpop.eup %1463  ;;  %v1030_v37 = vsub.f32 0.0, %v2708_v8  ;;  %v3026_v53 = vld [vmem:[#allocation17_spill] sm:$0xff] }
 0x26e   :  { %v967_v45 = vsub.f32 1.0, %v1462_v31  ;;  %v968_v15 = vsub.f32 1.0, %v1464_v10  ;;  %v1093_v31 = vmul.f32 %v1061_v57, %v2661_v35 }
 0x26f   :  { %v2800_v24 = vsub.f32 %v784_v13, %v2691_v23  ;;  %v1252_v11 = vadd.f32 %v1251_v30, %v1089_v40  ;;  %1477 = vpow2.f32 %v927_v25  ;;  %v1062_v40 = vmul.f32 %v1030_v37, %v998_v42  ;;  %v3030_v42 = vld [vmem:[#allocation21_spill] sm:$0xff] }
 0x270   :  { %v2733_v9 = vpop.xlane.xlu1 %591  ;;  %v2735_v17 = vpop.xlane.xlu0 %696 }
 0x271   :  { %v785_v48 = vsub.f32 %v2733_v9, %v3025_v21  ;;  %v1466_v9 = vpop.eup %1465  ;;  %v929_v51 = vmul.f32 1.442695, %v2800_v24  ;;  %v1253_v29 = vadd.f32 %v1252_v11, %v1090_v59  ;;  %v1031_v32 = vsub.f32 0.0, %v2735_v17 }
 0x272   :  { %v1468_v13 = vpop.eup %1467  ;;  %v969_v1 = vsub.f32 1.0, %v1466_v9  ;;  %v1000_v59 = vmul.f32 %v968_v15, %v968_v15  ;;  %v1094_v37 = vmul.f32 %v1062_v40, %v2673_v12 }
 0x273   :  { %v2818_v8 = vsub.f32 %v785_v48, %v2693_v60  ;;  %v1470_v19 = vpop.eup %1469  ;;  %v1254_v60 = vadd.f32 %v1253_v29, %v1091_v27  ;;  %v970_v30 = vsub.f32 1.0, %v1468_v13  ;;  %1479 = vpow2.f32 %v929_v51  ;;  %v3028_v48 = vld [vmem:[#allocation19_spill] sm:$0xff] }
 0x274   :  { %v2755_v18 = vpop.xlane.xlu1 %594  ;;  %v2757_v46 = vpop.xlane.xlu0 %699  ;;  %v971_v25 = vsub.f32 1.0, %v1470_v19 }
 0x275   :  { %v786_v63 = vsub.f32 %v2755_v18, %v3026_v53  ;;  %v3027_v18 = vld [vmem:[#allocation20_spill] sm:$0xff]  ;;  %v931_v39 = vmul.f32 1.442695, %v2818_v8  ;;  %v1032_v50 = vsub.f32 0.0, %v2757_v46  ;;  %v1472_v10 = vpop.eup %1471 }
 0x276   :  { %v972_v15 = vsub.f32 1.0, %v1472_v10 }
 0x277   :  { %v2825_v33 = vsub.f32 %v786_v63, %v2697_v20  ;;  %v1255_v20 = vadd.f32 %v1254_v60, %v1092_v55  ;;  %v1001_v63 = vmul.f32 %v969_v1, %v969_v1  ;;  %1481 = vpow2.f32 %v931_v39 }
 0x278   :  { %v2775_v54 = vpop.xlane.xlu1 %597  ;;  %v2777_v3 = vpop.xlane.xlu0 %702  ;;  %v1003_v55 = vmul.f32 %v971_v25, %v971_v25 }
 0x279   :  { %v787_v43 = vsub.f32 %v2775_v54, %v3027_v18  ;;  %v999_v54 = vmul.f32 %v967_v45, %v967_v45  ;;  %v933_v53 = vmul.f32 1.442695, %v2825_v33  ;;  %v1256_v27 = vadd.f32 %v1255_v20, %v1093_v31  ;;  %v3029_v45 = vld [vmem:[#allocation22_spill] sm:$0xff]  ;;  %v3032_v20 = vld [vmem:[#allocation23_spill] sm:$0xff] }
 0x27a   :  { %v1033_v57 = vsub.f32 0.0, %v2777_v3 }
 0x27b   :  { %v2832_v21 = vsub.f32 %v787_v43, %v2699_v16  ;;  %v1063_v35 = vmul.f32 %v1031_v32, %v999_v54  ;;  %v1474_v16 = vpop.eup %1473  ;;  %v1064_v43 = vmul.f32 %v1032_v50, %v1000_v59  ;;  %v1257_v19 = vadd.f32 %v1256_v27, %v1094_v37 }
 0x27c   :  { %v2793_v6 = vpop.xlane.xlu1 %600  ;;  %v2795_v0 = vpop.xlane.xlu0 %705  ;;  %1483 = vpow2.f32 %v933_v53  ;;  %v973_v40 = vsub.f32 1.0, %v1474_v16  ;;  %v1065_v60 = vmul.f32 %v1033_v57, %v1001_v63 }
 0x27d   :  { %v788_v17 = vsub.f32 %v2793_v6, %v3028_v48  ;;  %v1002_v6 = vmul.f32 %v970_v30, %v970_v30  ;;  %v1476_v46 = vpop.eup %1475  ;;  %v935_v51 = vmul.f32 1.442695, %v2832_v21  ;;  %v1034_v29 = vsub.f32 0.0, %v2795_v0  ;;  %v3031_v30 = vld [vmem:[#allocation24_spill] sm:$0xff] }
 0x27e   :  { %v1095_v3 = vmul.f32 %v1063_v35, %v2702_v58  ;;  %v1478_v1 = vpop.eup %1477  ;;  %v1096_v39 = vmul.f32 %v1064_v43, %v2720_v52  ;;  %v1097_v53 = vmul.f32 %v1065_v60, %v2726_v47 }
 0x27f   :  { %v2846_v12 = vsub.f32 %v788_v17, %v2710_v34  ;;  %1485 = vpow2.f32 %v935_v51  ;;  %v1066_v48 = vmul.f32 %v1034_v29, %v1002_v6  ;;  %v1004_v17 = vmul.f32 %v972_v15, %v972_v15  ;;  %v1480_v50 = vpop.eup %1479  ;;  %v3033_v51 = vld [vmem:[#allocation26_spill] sm:$0xff] }
 0x280   :  { %v2809_v41 = vpop.xlane.xlu1 %603  ;;  %v2811_v23 = vpop.xlane.xlu0 %708  ;;  %v975_v37 = vsub.f32 1.0, %v1478_v1 }
 0x281   :  { %v789_v13 = vsub.f32 %v2809_v41, %v3029_v45  ;;  %v1035_v34 = vsub.f32 0.0, %v2811_v23  ;;  %v937_v0 = vmul.f32 1.442695, %v2846_v12  ;;  %v1005_v23 = vmul.f32 %v973_v40, %v973_v40  ;;  %v1482_v47 = vpop.eup %1481 }
 0x282   :  { %v976_v45 = vsub.f32 1.0, %v1480_v50  ;;  %v977_v1 = vsub.f32 1.0, %v1482_v47  ;;  %v3039_v47 = vld [vmem:[#allocation27_spill] sm:$0xff] }
 0x283   :  { %v2852_v31 = vsub.f32 %v789_v13, %v2713_v2  ;;  %v1258_v2 = vadd.f32 %v1257_v19, %v1095_v3  ;;  %v1067_v63 = vmul.f32 %v1035_v34, %v1003_v55  ;;  %1487 = vpow2.f32 %v937_v0  ;;  %v3035_v0 = vld [vmem:[#allocation31_spill] sm:$0xff] }
 0x284   :  { %v607_v7 = vpop.xlane.xlu1 %606  ;;  %v2827_v4 = vpop.xlane.xlu0 %711 }
 0x285   :  { %v790_v18 = vsub.f32 %v607_v7, %v3030_v42  ;;  %v974_v7 = vsub.f32 1.0, %v1476_v46  ;;  %v1036_v25 = vsub.f32 0.0, %v2827_v4  ;;  %v1259_v57 = vadd.f32 %v1258_v2, %v1096_v39 }
 0x286   :  { %v1098_v4 = vmul.f32 %v1066_v48, %v2731_v26  ;;  %v1484_v19 = vpop.eup %1483 }
 0x287   :  { %v2857_v54 = vsub.f32 %v790_v18, %v2715_v61  ;;  %v939_v61 = vmul.f32 1.442695, %v2852_v31  ;;  %v1068_v13 = vmul.f32 %v1036_v25, %v1004_v17  ;;  %v1007_v18 = vmul.f32 %v975_v37, %v975_v37  ;;  %v3036_v17 = vld [vmem:[#allocation34_spill] sm:$0xff] }
 0x288   :  { %v610_v9 = vpop.xlane.xlu1 %609  ;;  %v2839_v11 = vpop.xlane.xlu0 %714  ;;  %v1260_v55 = vadd.f32 %v1259_v57, %v1097_v53  ;;  %v978_v2 = vsub.f32 1.0, %v1484_v19 }
 0x289   :  { %v791_v58 = vsub.f32 %v610_v9, %v3031_v30  ;;  %v1006_v9 = vmul.f32 %v974_v7, %v974_v7  ;;  %v941_v52 = vmul.f32 1.442695, %v2857_v54  ;;  %v1037_v27 = vsub.f32 0.0, %v2839_v11  ;;  %v3034_v11 = vld [vmem:[#allocation25_spill] sm:$0xff]  ;;  %v1486_v60 = vpop.eup %1485 }
 0x28a   :  { %1489 = vpow2.f32 %v939_v61  ;;  %v1261_v40 = vadd.f32 %v1260_v55, %v1098_v4  ;;  %v1100_v34 = vmul.f32 %v1068_v13, %v2762_v49  ;;  %v3038_v49 = vld [vmem:[#allocation6_spill] sm:$0xff]  ;;  %v979_v53 = vsub.f32 1.0, %v1486_v60 }
 0x28b   :  { %v2867_v16 = vsub.f32 %v791_v58, %v2717_v56  ;;  %v1099_v56 = vmul.f32 %v1067_v63, %v2744_v22  ;;  %1491 = vpow2.f32 %v941_v52  ;;  %v1069_v26 = vmul.f32 %v1037_v27, %v1005_v23 }
 0x28c   :  { %v613_v41 = vpop.xlane.xlu1 %612  ;;  %v718_v32 = vpop.xlane.xlu0 %717 }
 0x28d   :  { %v792_v59 = vsub.f32 %v613_v41, %v3032_v20  ;;  %v1038_v46 = vsub.f32 0.0, %v718_v32  ;;  %v1008_v32 = vmul.f32 %v976_v45, %v976_v45  ;;  %v1262_v48 = vadd.f32 %v1261_v40, %v1099_v56  ;;  %v1488_v61 = vpop.eup %1487  ;;  %v3040_v40 = vld [vmem:[#allocation29_spill] sm:$0xff] }
 0x28e   :  { %v1101_v25 = vmul.f32 %v1069_v26, %v2766_v14  ;;  %v860_v45 = vmul.f32 0.6931472, %v2770_v28  ;;  %v1011_v56 = vmul.f32 %v979_v53, %v979_v53 }
 0x28f   :  { %v2872_v6 = vsub.f32 %v792_v59, %v2728_v38  ;;  %v943_v38 = vmul.f32 1.442695, %v2867_v16  ;;  %v1070_v7 = vmul.f32 %v1038_v46, %v1006_v9  ;;  %v3037_v59 = vld [vmem:[#allocation28_spill] sm:$0xff]  ;;  %v1263_v63 = vadd.f32 %v1262_v48, %v1100_v34 }
 0x290   :  { %v616_v10 = vpop.xlane.xlu1 %615  ;;  %v721_v35 = vpop.xlane.xlu0 %720 }
 0x291   :  { %v793_v42 = vsub.f32 %v616_v10, %v3033_v51  ;;  %v1039_v3 = vsub.f32 0.0, %v721_v35  ;;  %v945_v41 = vmul.f32 1.442695, %v2872_v6  ;;  %1493 = vpow2.f32 %v943_v38 }
 0x292   :  { %v1009_v35 = vmul.f32 %v977_v1, %v977_v1  ;;  %v1102_v9 = vmul.f32 %v1070_v7, %v2773_v62  ;;  %v1264_v51 = vadd.f32 %v1263_v63, %v1101_v25 }
 0x293   :  { %v2881_v30 = vsub.f32 %v793_v42, %v3035_v0  ;;  %v1071_v23 = vmul.f32 %v1039_v3, %v1007_v18  ;;  %1495 = vpow2.f32 %v945_v41 }
 0x294   :  { %v619_v43 = vpop.xlane.xlu1 %618  ;;  %v724_v29 = vpop.xlane.xlu0 %723  ;;  %v1265_v28 = vadd.f32 %v1264_v51, %v1102_v9 }
 0x295   :  { %v794_v15 = vsub.f32 %v619_v43, %v3034_v11  ;;  %v1040_v22 = vsub.f32 0.0, %v724_v29  ;;  %v947_v52 = vmul.f32 1.442695, %v2881_v30  ;;  %v1103_v42 = vmul.f32 %v1071_v23, %v2789_v36  ;;  %v1490_v29 = vpop.eup %1489 }
 0x296   :  { %v1010_v43 = vmul.f32 %v978_v2, %v978_v2  ;;  %v980_v11 = vsub.f32 1.0, %v1488_v61  ;;  %v981_v60 = vsub.f32 1.0, %v1490_v29 }
 0x297   :  { %v2884_v20 = vsub.f32 %v794_v15, %v3036_v17  ;;  %v1072_v27 = vmul.f32 %v1040_v22, %v1008_v32  ;;  %v1492_v15 = vpop.eup %1491  ;;  %1497 = vpow2.f32 %v947_v52  ;;  %v1266_v1 = vadd.f32 %v1265_v28, %v1103_v42 }
 0x298   :  { %v622_v58 = vpop.xlane.xlu1 %621  ;;  %v727_v39 = vpop.xlane.xlu0 %726  ;;  %v982_v0 = vsub.f32 1.0, %v1492_v15  ;;  %v1012_v17 = vmul.f32 %v980_v11, %v980_v11 }
 0x299   :  { %v795_v50 = vsub.f32 %v622_v58, %v3037_v59  ;;  %v1041_v10 = vsub.f32 0.0, %v727_v39  ;;  %v949_v14 = vmul.f32 1.442695, %v2884_v20  ;;  %v1104_v19 = vmul.f32 %v1072_v27, %v2800_v24 }
 0x29a   :  { %v862_v24 = vmul.f32 0.6931472, %v2784_v5  ;;  %v1014_v61 = vmul.f32 %v982_v0, %v982_v0 }
 0x29b   :  { %v2889_v37 = vsub.f32 %v795_v50, %v3038_v49  ;;  %v1073_v18 = vmul.f32 %v1041_v10, %v1009_v35  ;;  %1499 = vpow2.f32 %v949_v14  ;;  %v1494_v22 = vpop.eup %1493  ;;  %v1267_v58 = vadd.f32 %v1266_v1, %v1104_v19 }
 0x29c   :  { %v625_v57 = vpop.xlane.xlu1 %624  ;;  %v730_v4 = vpop.xlane.xlu0 %729  ;;  %v1013_v49 = vmul.f32 %v981_v60, %v981_v60  ;;  %v983_v27 = vsub.f32 1.0, %v1494_v22 }
 0x29d   :  { %v796_v13 = vsub.f32 %v625_v57, %v3039_v47  ;;  %v1042_v46 = vsub.f32 0.0, %v730_v4  ;;  %v951_v62 = vmul.f32 1.442695, %v2889_v37  ;;  %v1496_v50 = vpop.eup %1495 }
 0x29e   :  { %v984_v52 = vsub.f32 1.0, %v1496_v50 }
 0x29f   :  { %v2899_v55 = vsub.f32 %v796_v13, %v2813_v44  ;;  %v1074_v38 = vmul.f32 %v1042_v46, %v1010_v43  ;;  %v1105_v44 = vmul.f32 %v1073_v18, %v2818_v8  ;;  %1501 = vpow2.f32 %v951_v62  ;;  %v3041_v8 = vld [vmem:[#allocation30_spill] sm:$0xff] }
 0x2a0   :  { %v628_v26 = vpop.xlane.xlu1 %627  ;;  %v733_v3 = vpop.xlane.xlu0 %732  ;;  %v1016_v42 = vmul.f32 %v984_v52, %v984_v52  ;;  %v1015_v43 = vmul.f32 %v983_v27, %v983_v27 }
 0x2a1   :  { %v953_v36 = vmul.f32 1.442695, %v2899_v55  ;;  %v797_v41 = vsub.f32 %v628_v26, %v3040_v40  ;;  %v1043_v32 = vsub.f32 0.0, %v733_v3  ;;  %v1106_v39 = vmul.f32 %v1074_v38, %v2825_v33  ;;  %v1498_v47 = vpop.eup %1497 }
 0x2a2   :  { %v1268_v10 = vadd.f32 %v1267_v58, %v1105_v44 }
 0x2a3   :  { %v2905_v34 = vsub.f32 %v797_v41, %v860_v45  ;;  %v1075_v7 = vmul.f32 %v1043_v32, %v1011_v56  ;;  %1503 = vpow2.f32 %v953_v36 }
 0x2a4   :  { %v631_v48 = vpop.xlane.xlu1 %630  ;;  %v736_v59 = vpop.xlane.xlu0 %735  ;;  %v1269_v63 = vadd.f32 %v1268_v10, %v1106_v39 }
 0x2a5   :  { %v955_v2 = vmul.f32 1.442695, %v2905_v34  ;;  %v798_v25 = vsub.f32 %v631_v48, %v3041_v8  ;;  %v1044_v23 = vsub.f32 0.0, %v736_v59  ;;  %v1107_v35 = vmul.f32 %v1075_v7, %v2832_v21  ;;  %v1500_v13 = vpop.eup %1499 }
 0x2a6   :  { %v986_v19 = vsub.f32 1.0, %v1500_v13 }
 0x2a7   :  { %v2912_v53 = vsub.f32 %v798_v25, %v862_v24  ;;  %v1076_v5 = vmul.f32 %v1044_v23, %v1012_v17  ;;  %1505 = vpow2.f32 %v955_v2  ;;  %v1270_v46 = vadd.f32 %v1269_v63, %v1107_v35 }
 0x2a8   :  { %v742_v33 = vpop.xlane.xlu1 %741  ;;  %v739_v9 = vpop.xlane.xlu0 %738  ;;  %v1018_v22 = vmul.f32 %v986_v19, %v986_v19 }
 0x2a9   :  { %v957_v57 = vmul.f32 1.442695, %v2912_v53  ;;  %v1108_v4 = vmul.f32 %v1076_v5, %v2846_v12  ;;  %v1046_v45 = vsub.f32 0.0, %v742_v33  ;;  %v1045_v14 = vsub.f32 0.0, %v739_v9  ;;  %v1502_v62 = vpop.eup %1501 }
 0x2aa   :  { %v985_v12 = vsub.f32 1.0, %v1498_v47  ;;  %v987_v1 = vsub.f32 1.0, %v1502_v62 }
 0x2ab   :  { %1507 = vpow2.f32 %v957_v57  ;;  %v1078_v21 = vmul.f32 %v1046_v45, %v1014_v61  ;;  %v1077_v51 = vmul.f32 %v1045_v14, %v1013_v49  ;;  %v1271_v56 = vadd.f32 %v1270_v46, %v1108_v4 }
 0x2ac   :  { %v748_v18 = vpop.xlane.xlu1 %747  ;;  %v745_v29 = vpop.xlane.xlu0 %744  ;;  %v1019_v50 = vmul.f32 %v987_v1, %v987_v1 }
 0x2ad   :  { %v1109_v11 = vmul.f32 %v1077_v51, %v2852_v31  ;;  %v1048_v15 = vsub.f32 0.0, %v748_v18  ;;  %v1047_v28 = vsub.f32 0.0, %v745_v29  ;;  %v1504_v38 = vpop.eup %1503  ;;  %v1110_v26 = vmul.f32 %v1078_v21, %v2857_v54 }
 0x2ae   :  { %v1017_v31 = vmul.f32 %v985_v12, %v985_v12  ;;  %v988_v58 = vsub.f32 1.0, %v1504_v38 }
 0x2af   :  { %v1272_v3 = vadd.f32 %v1271_v56, %v1109_v11  ;;  %v1080_v36 = vmul.f32 %v1048_v15, %v1016_v42  ;;  %v1079_v40 = vmul.f32 %v1047_v28, %v1015_v43  ;;  %v1250_v15 = vld [vmem:[#allocation2] sm:$0x1] }
 0x2b0   :  { %v754_v41 = vpop.xlane.xlu1 %753  ;;  %v751_v32 = vpop.xlane.xlu0 %750  ;;  %v1020_v35 = vmul.f32 %v988_v58, %v988_v58 }
 0x2b1   :  { %v1273_v44 = vadd.f32 %v1272_v3, %v1110_v26  ;;  %v1111_v60 = vmul.f32 %v1079_v40, %v2867_v16  ;;  %v1050_v7 = vsub.f32 0.0, %v754_v41  ;;  %v1506_v0 = vpop.eup %1505  ;;  %v1049_v24 = vsub.f32 0.0, %v751_v32 }
 0x2b2   :  { %v1112_v39 = vmul.f32 %v1080_v36, %v2872_v6  ;;  %v989_v49 = vsub.f32 1.0, %v1506_v0 }
 0x2b3   :  { %v1274_v48 = vadd.f32 %v1273_v44, %v1111_v60  ;;  %v1082_v17 = vmul.f32 %v1050_v7, %v1018_v22  ;;  %v1081_v54 = vmul.f32 %v1049_v24, %v1017_v31 }
 0x2b4   :  { %v760_v59 = vpop.xlane.xlu1 %759  ;;  %v757_v2 = vpop.xlane.xlu0 %756  ;;  %v1021_v45 = vmul.f32 %v989_v49, %v989_v49 }
 0x2b5   :  { %v1508_v8 = vpop.eup %1507  ;;  %v1275_v25 = vadd.f32 %v1274_v48, %v1112_v39  ;;  %v1052_v23 = vsub.f32 0.0, %v760_v59  ;;  %v1051_v10 = vsub.f32 0.0, %v757_v2  ;;  %v1113_v16 = vmul.f32 %v1081_v54, %v2881_v30 }
 0x2b6   :  { %v990_v5 = vsub.f32 1.0, %v1508_v8  ;;  %v1114_v63 = vmul.f32 %v1082_v17, %v2884_v20 }
 0x2b7   :  { %v1083_v61 = vmul.f32 %v1051_v10, %v1019_v50  ;;  %v1276_v33 = vadd.f32 %v1275_v25, %v1113_v16  ;;  %v1084_v6 = vmul.f32 %v1052_v23, %v1020_v35 }
 0x2b8   :  { %v1022_v9 = vmul.f32 %v990_v5, %v990_v5  ;;  %v766_v52 = vpop.xlane.xlu1 %765  ;;  %v763_v27 = vpop.xlane.xlu0 %762 }
 0x2b9   :  { %v1115_v57 = vmul.f32 %v1083_v61, %v2889_v37  ;;  %v1054_v4 = vsub.f32 0.0, %v766_v52  ;;  %v1053_v14 = vsub.f32 0.0, %v763_v27  ;;  %v1277_v47 = vadd.f32 %v1276_v33, %v1114_v63 }
 0x2ba   :  { %v1116_v46 = vmul.f32 %v1084_v6, %v2899_v55 }
 0x2bb   :  { %v1085_v13 = vmul.f32 %v1053_v14, %v1021_v45  ;;  %v1278_v30 = vadd.f32 %v1277_v47, %v1115_v57  ;;  %v1086_v21 = vmul.f32 %v1054_v4, %v1022_v9 }
 0x2bd   :  { %v1117_v51 = vmul.f32 %v1085_v13, %v2905_v34  ;;  %v1279_v42 = vadd.f32 %v1278_v30, %v1116_v46  ;;  %v1118_v20 = vmul.f32 %v1086_v21, %v2912_v53 }
 0x2bf   :  { %v1280_v18 = vadd.f32 %v1279_v42, %v1117_v51 }
 0x2c1   :  { %v1281_v43 = vadd.f32 %v1280_v18, %v1118_v20 }
 0x2c3   :  { %v1282_v29 = vrot.slane %v1281_v43, 4 }
 0x2c5   :  { %v1283_v62 = vadd.f32 %v1282_v29, %v1281_v43 }
 0x2c7   :  { %v1284_v56 = vrot.slane %v1283_v62, 2 }
 0x2c9   :  { %v1285_v37 = vadd.f32 %v1284_v56, %v1283_v62 }
 0x2cb   :  { %v1286_v11 = vrot.slane %v1285_v37, 1 }
 0x2cd   :  { %v1287_v28 = vadd.f32 %v1286_v11, %v1285_v37 }
 0x2cf   :  { %v1288_v19 = vadd.f32 %v1287_v28, %v1250_v15 }
 0x2d1   :  { %1290 = vst.msk [vmem:[#allocation2] sm:$0x1] %vm19_vm0, %v1288_v19 }
 0x2d8   :  { %v1294_v55 = vld [vmem:[#allocation2] sm:$0x1] }
 0x2d9   :  { %v1295_v12 = vmul.f32 0.00390625, %v1294_v55 }
 0x2db   :  { %1296 = vst.msk [vmem:[#allocation2] sm:$0x1] %vm19_vm0, %v1295_v12 }
 0x2dc   :  { %1529 = shalt.err (!%p1526_p4)
}
 0x2dd   :  { %s1530_s28 = scalar_lea.hbm %s2943_s3, 16 }
 0x2de   :  { %p1531_p5 = scmp.ne.s32.totalorder %s2943_s3, %s1530_s28  ;;  %p1534_p6 = scmp.lt.u32.totalorder %s1530_s28, %s2943_s3 }
 0x2e0   :  { %p1536_p7 = pnand %p1534_p6, %p1531_p5 }
 0x2e2   :  { %1539 = shalt.err (!%p1536_p7)
}
 0x2e3   :  { %1306 = dma.vmem_to_hbm [thread:$0]  %s1304_s23, 16, %s2943_s3, [#allocation3]  }
 0x2e4   :  { %1540 = dma.done.wait [#allocation3], 16  }
 0x2e5   :  { %1541 = vsyncadd [#allocation3], 4294967280 }
 0x2e6   :  { %1310 = vsyncpa [#allocation3], 1 }

</bundles_post_ra>
